<compile_context>
chip_gen: v5e
topology: v5e:2x2
jax: 0.10.0
libtpu: 0.0.40
codegen_flags: <defaults>
</compile_context>

<pallas_src>
import functools

import jax
import jax.numpy as jnp
from jax.experimental import pallas as pl
from jax.experimental.pallas import tpu as pltpu


def _round_up(n, k):
    return ((n + k - 1) // k) * k


def _default_dtypes():
    """(matmul_operand_dtype, activation_dtype) chosen per TPU generation."""
    kind = ""
    try:
        kind = jax.devices()[0].device_kind.lower()
    except Exception:
        pass
    if ("v6" in kind) or ("v7" in kind):
        return jnp.bfloat16, jnp.bfloat16      # bf16 MXU + bf16 VALU/EUP
    if "v5" in kind:
        return jnp.bfloat16, jnp.float32       # bf16 MXU, f32-only VPU/EUP
    return jnp.float32, jnp.float32            # unknown / older: exact


def _pick_tile_n(nex, tile_n):
    nex128 = _round_up(nex, 128)
    tn = max(128, min(_round_up(tile_n, 128), nex128))
    if nex128 >= 256:
        # Ensure >=2 grid steps so dimension_semantics=("parallel",) really
        # uses both TensorCores on v7x; harmless on single-TC v5e/v6e.
        while tn > 128 and pl.cdiv(nex128, tn) < 2:
            tn = _round_up(tn // 2, 128)
    return tn


def _phi_kernel(xt_ref, w0_ref, wh_ref, bh_ref, wlin_ref, syma_ref, cw_ref,
                out_ref, *, n_hidden, mm_dtype, act_dtype):
    """One (dp1_pad, TILE_N) batch tile of SinePhi, feature-major layout."""
    h = 1.0 / n_hidden                         # SineResNN step 1/(n_layers-1)
    xt = xt_ref[...]                           # (dp1p, TN) f32, batch on lanes

    # ---- SineResNN, feature-major (u is (m, TN)) ----------------------------
    # Layer 0: b0 is folded into W0's "ones"-row column (homogeneous coords),
    # so a single matmul covers W0 @ x + b0.
    z0 = jnp.dot(w0_ref[...], xt.astype(mm_dtype),
                 preferred_element_type=jnp.float32)
    u = jnp.sin(z0.astype(act_dtype))

    def res_step(i, u):
        z = jnp.dot(wh_ref[i], u.astype(mm_dtype),
                    preferred_element_type=jnp.float32) + bh_ref[i]
        return u + h * jnp.sin(z.astype(act_dtype))

    if n_hidden <= 8:                          # shallow: static unroll is fine
        for i in range(n_hidden):
            u = res_step(i, u)
    else:                                      # deep: keep vreg live ranges flat
        u = jax.lax.fori_loop(0, n_hidden, res_step, u, unroll=True)

    # ---- w' * N(x): VPU multiply + sublane reduce (off the MXU) -------------
    nn_term = jnp.sum(wlin_ref[...] * u.astype(jnp.float32),
                      axis=0, keepdims=True)                        # (1, TN)

    # ---- 0.5 * x' (A'A) x : f32; independent of the ResNet tail -------------
    sx = jnp.dot(syma_ref[...], xt, preferred_element_type=jnp.float32)
    quad = 0.5 * jnp.sum(sx * xt, axis=0, keepdims=True)             # (1, TN)

    # ---- c(x): c_b folded into the ones-row entry of c_w; VPU + reduce ------
    lin = jnp.sum(cw_ref[...] * xt, axis=0, keepdims=True)           # (1, TN)

    out_ref[...] = nn_term + quad + lin                              # lane-dense


def sine_phi_forward(x, params, n_layers, *, tile_n=16384,
                     mm_dtype=None, act_dtype=None):
    """Phi(x) for x of shape (nex, d+1); returns (nex, 1) float32."""
    assert n_layers >= 2, "SineResNN requires n_layers >= 2 (h = 1/(n_layers-1))"
    nex, dp1 = x.shape
    m = params["W0"].shape[0]
    n_hidden = n_layers - 1

    d_mm, d_act = _default_dtypes()
    mm_dtype = d_mm if mm_dtype is None else mm_dtype
    act_dtype = d_act if act_dtype is None else act_dtype

    tn = _pick_tile_n(nex, tile_n)
    n_pad = _round_up(nex, tn)
    grid = (n_pad // tn,)

    # Feature-major input, feature dim padded to a sublane multiple with one
    # extra homogeneous "ones" row (bias folding for b0 / c_b).
    dp1p = _round_up(dp1 + 1, 8)
    ones_row = dp1
    xt = jnp.zeros((dp1p, n_pad), jnp.float32)
    xt = xt.at[:dp1, :nex].set(x.T.astype(jnp.float32))
    xt = xt.at[ones_row, :].set(1.0)
    # TODO(synk): production callers can hand in pre-padded feature-major input
    # to skip this HBM round-trip (a few % at most; the kernel is VALU-bound).

    # Parameter-only precompute, hoisted out of the kernel.
    w0p = jnp.zeros((m, dp1p), jnp.float32)
    w0p = w0p.at[:, :dp1].set(params["W0"])
    w0p = w0p.at[:, ones_row].set(params["b0"])            # fold b0 into W0
    w0p = w0p.astype(mm_dtype)

    wh = params["Wh"].astype(mm_dtype)                     # (n_hidden, m, m)
    bh = params["bh"].reshape(n_hidden, m, 1).astype(jnp.float32)
    wlin = params["w_lin"].reshape(m, 1).astype(jnp.float32)

    syma = (params["A"].T @ params["A"]).astype(jnp.float32)
    symap = jnp.zeros((dp1p, dp1p), jnp.float32).at[:dp1, :dp1].set(syma)

    cwp = jnp.zeros((dp1p, 1), jnp.float32)
    cwp = cwp.at[:dp1, 0].set(params["c_w"].reshape(dp1))
    cwp = cwp.at[ones_row, 0].set(params["c_b"].reshape(()))  # fold c_b

    def const(shape):
        # Full-array block with constant block index: stays VMEM-resident.
        return pl.BlockSpec(shape, lambda i, _n=len(shape): (0,) * _n)

    kernel = functools.partial(_phi_kernel, n_hidden=n_hidden,
                               mm_dtype=mm_dtype, act_dtype=act_dtype)
    out = pl.pallas_call(
        kernel,
        out_shape=jax.ShapeDtypeStruct((1, n_pad), jnp.float32),
        grid=grid,
        in_specs=[
            pl.BlockSpec((dp1p, tn), lambda i: (0, i)),     # x^T batch tile
            const((m, dp1p)),                               # W0 (+b0 col)
            const((n_hidden, m, m)),                        # Wh
            const((n_hidden, m, 1)),                        # bh
            const((m, 1)),                                  # w (column)
            const((dp1p, dp1p)),                            # A'A (padded)
            const((dp1p, 1)),                               # c weight (+c_b)
        ],
        out_specs=pl.BlockSpec((1, tn), lambda i: (0, i)),  # lane-dense output
        compiler_params=pltpu.CompilerParams(
            dimension_semantics=("parallel",),
            vmem_limit_bytes=32 * 1024 * 1024),
    )(xt, w0p, wh, bh, wlin, symap, cwp)

    return out[0, :nex].reshape(nex, 1)


def init_params(key, d, m, n_layers, r):
    """Deterministic params mirroring SinePhi.__init__ (PyTorch (out, in) layout)."""
    dp1 = d + 1
    r = min(r, dp1)
    n_hidden = n_layers - 1
    k0, k1, k2, k3, k4 = jax.random.split(key, 5)

    # nn.Linear default init: U(-1/sqrt(fan_in), 1/sqrt(fan_in))
    lim0 = 1.0 / (dp1 ** 0.5)
    W0 = jax.random.uniform(k0, (m, dp1), jnp.float32, -lim0, lim0)
    b0 = jax.random.uniform(k1, (m,), jnp.float32, -lim0, lim0)

    limh = 1.0 / (m ** 0.5)
    W1 = jax.random.uniform(k2, (m, m), jnp.float32, -limh, limh)
    b1 = jax.random.uniform(k3, (m,), jnp.float32, -limh, limh)
    # layers[2:] are deep copies of layers[1] -> identical values replicated.
    Wh = jnp.stack([W1] * n_hidden, axis=0)          # (n_hidden, m, m)
    bh = jnp.stack([b1] * n_hidden, axis=0)          # (n_hidden, m)

    # A: xavier_uniform_ on (r, d+1)
    bound = (6.0 / (r + dp1)) ** 0.5
    A = jax.random.uniform(k4, (r, dp1), jnp.float32, -bound, bound)

    # w: Linear(m, 1, bias=False) with weight forced to ones
    w_lin = jnp.ones((1, m), jnp.float32)
    # c: Linear(d+1, 1) with weight and bias forced to zeros
    c_w = jnp.zeros((1, dp1), jnp.float32)
    c_b = jnp.zeros((1,), jnp.float32)

    return {"W0": W0, "b0": b0, "Wh": Wh, "bh": bh,
            "A": A, "w_lin": w_lin, "c_w": c_w, "c_b": c_b}


def sine_phi_reference(x, params, n_layers):
    """Pure-JAX reference (mirrors the PyTorch forward) for correctness checks."""
    n_hidden = n_layers - 1
    h = 1.0 / n_hidden
    u = jnp.sin(x @ params["W0"].T + params["b0"])
    for i in range(n_hidden):
        u = u + h * jnp.sin(u @ params["Wh"][i].T + params["bh"][i])
    nn_term = u @ params["w_lin"].T
    symA = params["A"].T @ params["A"]
    quad = 0.5 * jnp.sum((x @ symA) * x, axis=1, keepdims=True)
    lin = x @ params["c_w"].T + params["c_b"]
    return nn_term + quad + lin


if __name__ == "__main__":
    # Small shapes consistent with the module: space dim d=3 -> inputs (nex, d+1).
    d, m, n_layers, r = 3, 32, 3, 10

    key = jax.random.PRNGKey(0)
    kx, kx2, kp = jax.random.split(key, 3)
    params = init_params(kp, d, m, n_layers, r)

    # ---- exact-semantics checks (forced full f32), single- and multi-tile ----
    nex = 16
    x = jax.random.normal(kx, (nex, d + 1), jnp.float32)
    out = jax.block_until_ready(
        sine_phi_forward(x, params, n_layers,
                         mm_dtype=jnp.float32, act_dtype=jnp.float32))
    ref = sine_phi_reference(x, params, n_layers)
    assert out.shape == (nex, 1)
    assert jnp.allclose(out, ref, atol=1e-5, rtol=1e-5), (
        f"f32 mismatch (small): max abs err {jnp.max(jnp.abs(out - ref))}")

    nex2 = 700
    x2 = jax.random.normal(kx2, (nex2, d + 1), jnp.float32)
    out2 = jax.block_until_ready(
        sine_phi_forward(x2, params, n_layers, tile_n=256,
                         mm_dtype=jnp.float32, act_dtype=jnp.float32))
    ref2 = sine_phi_reference(x2, params, n_layers)
    assert out2.shape == (nex2, 1)
    assert jnp.allclose(out2, ref2, atol=1e-5, rtol=1e-5), (
        f"f32 mismatch (multi-tile): max abs err {jnp.max(jnp.abs(out2 - ref2))}")

    # ---- default per-generation mixed-precision path (loose sanity check) ----
    # bf16 activations/operands lose ~3 decimal digits vs. the f32 reference;
    # strict correctness is established by the f32 runs above.
    out3 = jax.block_until_ready(sine_phi_forward(x2, params, n_layers))
    assert out3.shape == (nex2, 1)
    assert jnp.allclose(out3, ref2, atol=2e-1, rtol=5e-2), (
        f"mixed-precision mismatch: max abs err {jnp.max(jnp.abs(out3 - ref2))}")

    print("KERNEL_OK")
</pallas_src>

<mosaic_0001>
module attributes {stable_mosaic.version = 11 : i64} {
  func.func @_phi_kernel(%arg0: i32, %arg1: memref<8x128xf32, #tpu.memory_space<vmem>>, %arg2: memref<32x8xf32, #tpu.memory_space<vmem>>, %arg3: memref<2x32x32xf32, #tpu.memory_space<vmem>>, %arg4: memref<2x32x1xf32, #tpu.memory_space<vmem>>, %arg5: memref<32x1xf32, #tpu.memory_space<vmem>>, %arg6: memref<8x8xf32, #tpu.memory_space<vmem>>, %arg7: memref<8x1xf32, #tpu.memory_space<vmem>>, %arg8: memref<1x128xf32, #tpu.memory_space<vmem>>) attributes {dimension_semantics = [#tpu.dimension_semantics<parallel>], iteration_bounds = array<i64: 1>, scalar_prefetch = 0 : i64, scratch_operands = 0 : i64, tpu.core_type = #tpu.core_type<tc>, window_params = [{transform_indices = @transform_0, window_bounds = array<i64: 8, 128>}, {pipeline_mode = #tpu.pipeline_mode<synchronous>, transform_indices = @transform_1, window_bounds = array<i64: 32, 8>}, {pipeline_mode = #tpu.pipeline_mode<synchronous>, transform_indices = @transform_2, window_bounds = array<i64: 2, 32, 32>}, {pipeline_mode = #tpu.pipeline_mode<synchronous>, transform_indices = @transform_3, window_bounds = array<i64: 2, 32, 1>}, {pipeline_mode = #tpu.pipeline_mode<synchronous>, transform_indices = @transform_4, window_bounds = array<i64: 32, 1>}, {pipeline_mode = #tpu.pipeline_mode<synchronous>, transform_indices = @transform_5, window_bounds = array<i64: 8, 8>}, {pipeline_mode = #tpu.pipeline_mode<synchronous>, transform_indices = @transform_6, window_bounds = array<i64: 8, 1>}, {transform_indices = @transform_7, window_bounds = array<i64: 1, 128>}]} {
    %c0 = arith.constant 0 : index
    %c0_0 = arith.constant 0 : index
    %0 = vector.load %arg1[%c0, %c0_0] : memref<8x128xf32, #tpu.memory_space<vmem>>, vector<8x128xf32>
    %c0_1 = arith.constant 0 : index
    %c0_2 = arith.constant 0 : index
    %1 = vector.load %arg2[%c0_1, %c0_2] : memref<32x8xf32, #tpu.memory_space<vmem>>, vector<32x8xf32>
    %cst = arith.constant dense<0.000000e+00> : vector<32x128xf32>
    %2 = tpu.matmul %1, %0, %cst {dimension_numbers = #tpu.dot_dimension_numbers<[1], [0], [0], [1], [0, 0, 1, 1], [], []>} : vector<32x8xf32>, vector<8x128xf32>, vector<32x128xf32> -> vector<32x128xf32>
    %3 = math.sin %2 : vector<32x128xf32>
    %c0_3 = arith.constant 0 : index
    %c0_4 = arith.constant 0 : index
    %c0_5 = arith.constant 0 : index
    %4 = vector.load %arg3[%c0_3, %c0_4, %c0_5] : memref<2x32x32xf32, #tpu.memory_space<vmem>>, vector<1x32x32xf32>
    %5 = vector.shape_cast %4 : vector<1x32x32xf32> to vector<32x32xf32>
    %cst_6 = arith.constant dense<0.000000e+00> : vector<32x128xf32>
    %6 = tpu.matmul %5, %3, %cst_6 {dimension_numbers = #tpu.dot_dimension_numbers<[1], [0], [0], [1], [0, 0, 1, 1], [], []>} : vector<32x32xf32>, vector<32x128xf32>, vector<32x128xf32> -> vector<32x128xf32>
    %c0_7 = arith.constant 0 : index
    %c0_8 = arith.constant 0 : index
    %c0_9 = arith.constant 0 : index
    %7 = vector.load %arg4[%c0_7, %c0_8, %c0_9] : memref<2x32x1xf32, #tpu.memory_space<vmem>>, vector<1x32x1xf32>
    %8 = vector.shape_cast %7 : vector<1x32x1xf32> to vector<32x1xf32>
    %9 = vector.broadcast %8 : vector<32x1xf32> to vector<32x128xf32>
    %10 = arith.addf %6, %9 : vector<32x128xf32>
    %11 = math.sin %10 : vector<32x128xf32>
    %cst_10 = arith.constant 5.000000e-01 : f32
    %12 = vector.broadcast %cst_10 : f32 to vector<32x128xf32>
    %13 = arith.mulf %12, %11 : vector<32x128xf32>
    %14 = arith.addf %3, %13 : vector<32x128xf32>
    %c1 = arith.constant 1 : index
    %c0_11 = arith.constant 0 : index
    %c0_12 = arith.constant 0 : index
    %15 = vector.load %arg3[%c1, %c0_11, %c0_12] : memref<2x32x32xf32, #tpu.memory_space<vmem>>, vector<1x32x32xf32>
    %16 = vector.shape_cast %15 : vector<1x32x32xf32> to vector<32x32xf32>
    %cst_13 = arith.constant dense<0.000000e+00> : vector<32x128xf32>
    %17 = tpu.matmul %16, %14, %cst_13 {dimension_numbers = #tpu.dot_dimension_numbers<[1], [0], [0], [1], [0, 0, 1, 1], [], []>} : vector<32x32xf32>, vector<32x128xf32>, vector<32x128xf32> -> vector<32x128xf32>
    %c1_14 = arith.constant 1 : index
    %c0_15 = arith.constant 0 : index
    %c0_16 = arith.constant 0 : index
    %18 = vector.load %arg4[%c1_14, %c0_15, %c0_16] : memref<2x32x1xf32, #tpu.memory_space<vmem>>, vector<1x32x1xf32>
    %19 = vector.shape_cast %18 : vector<1x32x1xf32> to vector<32x1xf32>
    %20 = vector.broadcast %19 : vector<32x1xf32> to vector<32x128xf32>
    %21 = arith.addf %17, %20 : vector<32x128xf32>
    %22 = math.sin %21 : vector<32x128xf32>
    %cst_17 = arith.constant 5.000000e-01 : f32
    %23 = vector.broadcast %cst_17 : f32 to vector<32x128xf32>
    %24 = arith.mulf %23, %22 : vector<32x128xf32>
    %25 = arith.addf %14, %24 : vector<32x128xf32>
    %c0_18 = arith.constant 0 : index
    %c0_19 = arith.constant 0 : index
    %26 = vector.load %arg5[%c0_18, %c0_19] : memref<32x1xf32, #tpu.memory_space<vmem>>, vector<32x1xf32>
    %27 = vector.broadcast %26 : vector<32x1xf32> to vector<32x128xf32>
    %28 = arith.mulf %27, %25 : vector<32x128xf32>
    %cst_20 = arith.constant dense<0.000000e+00> : vector<128xf32>
    %29 = vector.multi_reduction <add>, %28, %cst_20 [0] : vector<32x128xf32> to vector<128xf32>
    %30 = vector.shape_cast %29 : vector<128xf32> to vector<1x128xf32>
    %c0_21 = arith.constant 0 : index
    %c0_22 = arith.constant 0 : index
    %31 = vector.load %arg6[%c0_21, %c0_22] : memref<8x8xf32, #tpu.memory_space<vmem>>, vector<8x8xf32>
    %cst_23 = arith.constant dense<0.000000e+00> : vector<8x128xf32>
    %32 = tpu.matmul %31, %0, %cst_23 {dimension_numbers = #tpu.dot_dimension_numbers<[1], [0], [0], [1], [0, 0, 1, 1], [], []>} : vector<8x8xf32>, vector<8x128xf32>, vector<8x128xf32> -> vector<8x128xf32>
    %33 = arith.mulf %32, %0 : vector<8x128xf32>
    %cst_24 = arith.constant dense<0.000000e+00> : vector<128xf32>
    %34 = vector.multi_reduction <add>, %33, %cst_24 [0] : vector<8x128xf32> to vector<128xf32>
    %35 = vector.shape_cast %34 : vector<128xf32> to vector<1x128xf32>
    %cst_25 = arith.constant 5.000000e-01 : f32
    %36 = vector.broadcast %cst_25 : f32 to vector<1x128xf32>
    %37 = arith.mulf %36, %35 : vector<1x128xf32>
    %c0_26 = arith.constant 0 : index
    %c0_27 = arith.constant 0 : index
    %38 = vector.load %arg7[%c0_26, %c0_27] : memref<8x1xf32, #tpu.memory_space<vmem>>, vector<8x1xf32>
    %39 = vector.broadcast %38 : vector<8x1xf32> to vector<8x128xf32>
    %40 = arith.mulf %39, %0 : vector<8x128xf32>
    %cst_28 = arith.constant dense<0.000000e+00> : vector<128xf32>
    %41 = vector.multi_reduction <add>, %40, %cst_28 [0] : vector<8x128xf32> to vector<128xf32>
    %42 = vector.shape_cast %41 : vector<128xf32> to vector<1x128xf32>
    %43 = arith.addf %30, %37 : vector<1x128xf32>
    %44 = arith.addf %43, %42 : vector<1x128xf32>
    %c0_29 = arith.constant 0 : index
    %c0_30 = arith.constant 0 : index
    %45 = vector.load %arg8[%c0_29, %c0_30] : memref<1x128xf32, #tpu.memory_space<vmem>>, vector<1x128xf32>
    tpu.vector_store %arg8[%c0_29, %c0_30], %44 {strides = array<i32>} : memref<1x128xf32, #tpu.memory_space<vmem>>, vector<1x128xf32>,
    return
  }
  func.func @transform_0(%arg0: i32) -> (i32, i32) {
    %c0_i32 = arith.constant 0 : i32
    %c0_i32_0 = arith.constant 0 : i32
    return %c0_i32, %arg0 : i32, i32
  }
  func.func @transform_1(%arg0: i32) -> (i32, i32) {
    %c0_i32 = arith.constant 0 : i32
    %c0_i32_0 = arith.constant 0 : i32
    %c0_i32_1 = arith.constant 0 : i32
    return %c0_i32, %c0_i32_0 : i32, i32
  }
  func.func @transform_2(%arg0: i32) -> (i32, i32, i32) {
    %c0_i32 = arith.constant 0 : i32
    %c0_i32_0 = arith.constant 0 : i32
    %c0_i32_1 = arith.constant 0 : i32
    %c0_i32_2 = arith.constant 0 : i32
    return %c0_i32, %c0_i32_0, %c0_i32_1 : i32, i32, i32
  }
  func.func @transform_3(%arg0: i32) -> (i32, i32, i32) {
    %c0_i32 = arith.constant 0 : i32
    %c0_i32_0 = arith.constant 0 : i32
    %c0_i32_1 = arith.constant 0 : i32
    %c0_i32_2 = arith.constant 0 : i32
    return %c0_i32, %c0_i32_0, %c0_i32_1 : i32, i32, i32
  }
  func.func @transform_4(%arg0: i32) -> (i32, i32) {
    %c0_i32 = arith.constant 0 : i32
    %c0_i32_0 = arith.constant 0 : i32
    %c0_i32_1 = arith.constant 0 : i32
    return %c0_i32, %c0_i32_0 : i32, i32
  }
  func.func @transform_5(%arg0: i32) -> (i32, i32) {
    %c0_i32 = arith.constant 0 : i32
    %c0_i32_0 = arith.constant 0 : i32
    %c0_i32_1 = arith.constant 0 : i32
    return %c0_i32, %c0_i32_0 : i32, i32
  }
  func.func @transform_6(%arg0: i32) -> (i32, i32) {
    %c0_i32 = arith.constant 0 : i32
    %c0_i32_0 = arith.constant 0 : i32
    %c0_i32_1 = arith.constant 0 : i32
    return %c0_i32, %c0_i32_0 : i32, i32
  }
  func.func @transform_7(%arg0: i32) -> (i32, i32) {
    %c0_i32 = arith.constant 0 : i32
    %c0_i32_0 = arith.constant 0 : i32
    return %c0_i32, %arg0 : i32, i32
  }
}

</mosaic_0001>

<bundles_post_ra>
// kernel: tpu_custom_call.1
= control target key start
LH: loop header
LB: loop body
LE: loop exit
PB: predicated region body
PF: predicated region fallthrough
CT: control target
= control target key end

     0   :  { %vm32_vm0 = vcmask 64512   ;;  %s3868_s0 = inlined_call_operand.vmem [shape: f32[8,128], index: 0, kind: input, shape index: {}]   ;;  %s3869_s1 = inlined_call_operand.vmem [shape: f32[32,8], index: 1, kind: input, shape index: {}]   ;;  %s3870_s2 = inlined_call_operand.vmem [shape: f32[2,32,32], index: 2, kind: input, shape index: {}]   ;;  %s3871_s3 = inlined_call_operand.vmem [shape: f32[2,32,1], index: 3, kind: input, shape index: {}]   ;;  %s3872_s4 = inlined_call_operand.vmem [shape: f32[32,1], index: 4, kind: input, shape index: {}]   ;;  %s3873_s5 = inlined_call_operand.vmem [shape: f32[8,8], index: 5, kind: input, shape index: {}]   ;;  %s3874_s6 = inlined_call_operand.vmem [shape: f32[8,1], index: 6, kind: input, shape index: {}]   ;;  %s3875_s7 = inlined_call_operand.hbm [shape: f32[1,128], index: 7, kind: output, shape index: {}]  }
   0x1   :  { %v27_v0 = vld [vmem:[%s3868_s0] sm:$0xff] }
   0x2   :  { %v28_v1 = vld [vmem:[%s3869_s1] sm:$0xff]  ;;  %60 = vmatpush.msra.mxu0 %v27_v0 }
   0x3   :  { %12 = vsyncpa [#allocation3], 0  ;;  %2192 = vmatmul.msk.f32.vlgmr.msra.gmra.mxu0 %vm32_vm0, %v28_v1  ;;  %v29_v2 = vld [vmem:[%s3869_s1 + $0x8] sm:$0xff]  ;;  %v30_v3 = vld [vmem:[%s3869_s1 + $0x10] sm:$0xff]  ;;  %v2296_v5 = vmov 0   ;;  %s2183_s8 = sshll.u32 %s3875_s7, 4  ;;  %s2184_s8 = int_to_ptr.hbm [resolvable:$true] %s2183_s8 }
   0x4   :  { %v31_v4 = vld [vmem:[%s3869_s1 + $0x18] sm:$0xff]  ;;  %2265 = vset.pattern.permute.xlu0 %v2296_v5  ;;  %2266 = vset.pattern.permute.xlu1 %v2296_v5  ;;  %v2297_v25 = vmov 683565275   ;;  %v2298_v27 = vmov 2475754826  }
   0x5   :  { %2267 = vset.pattern.permute.xlu2 %v2296_v5  ;;  %v2299_v29 = vmov 2131351028   ;;  %v2300_v31 = vmov 2102212464   ;;  %v2301_v36 = vmov 920167782  }
   0x6   :  { %v2302_v39 = vmov 1326507024  }
   0xb   :  { %2193 = vmatmul.msk.f32.gmra.mxu0 %vm32_vm0, %v29_v2 }
  0x13   :  { %2194 = vmatmul.msk.f32.gmra.mxu0 %vm32_vm0, %v30_v3 }
  0x1b   :  { %2195 = vmatmul.msk.f32.gmra.mxu0 %vm32_vm0, %v31_v4 }
  0x80   :  { %v2366_v6 = vpop.f32.mrf.mxu0 }
  0x81   :  { %v74_v7 = vand.u32 2147483647, %v2366_v6  ;;  %v77_v8 = vand.u32 2139095040, %v2366_v6 }
  0x83   :  { %v78_v9 = vshrl.u32 %v77_v8, 23  ;;  %v81_v10 = vand.u32 8388607, %v74_v7 }
  0x85   :  { %v2196_v11 = vadd.s32 4294967169, %v78_v9  ;;  %v82_v12 = vor.u32 8388608, %v81_v10 }
  0x87   :  { %v84_v13 = vadd.s32 1, %v2196_v11  ;;  %v2374_v15 = vshll.u32 %v82_v12, 8 }
  0x88   :  { %v2372_v14 = vpop.f32.mrf.mxu0 }
  0x89   :  { %vm85_vm1 = vcmp.gt.s32.totalorder %v84_v13, 0  ;;  %v229_v16 = vand.u32 2147483647, %v2372_v14  ;;  %v232_v18 = vand.u32 2139095040, %v2372_v14  ;;  %v123_v22 = vand.u32 65535, %v2374_v15 }
  0x8a   :  { %v86_v17 = vsel %vm85_vm1, %v84_v13, 0  ;;  %v124_v61 = vshrl.u32 %v2374_v15, 16 }
  0x8b   :  { %v88_v19 = vand.u32 31, %v86_v17  ;;  %v87_v20 = vshrl.u32 %v86_v17, 5  ;;  %v233_v23 = vshrl.u32 %v232_v18, 23  ;;  %v236_v24 = vand.u32 8388607, %v229_v16 }
  0x8d   :  { %v89_v21 = vsub.s32 32, %v88_v19  ;;  %v91_v26 = vshll.u32 %v2297_v25, %v88_v19  ;;  %v94_v28 = vshll.u32 %v2298_v27, %v88_v19  ;;  %v97_v30 = vshll.u32 %v2299_v29, %v88_v19 }
  0x8e   :  { %v100_v32 = vshll.u32 %v2300_v31, %v88_v19  ;;  %v103_v37 = vshll.u32 %v2301_v36, %v88_v19  ;;  %vm106_vm2 = vcmp.lt.s32.totalorder %v87_v20, 1  ;;  %vm107_vm3 = vcmp.lt.s32.totalorder %v87_v20, 2 }
  0x8f   :  { %v92_v33 = vshrl.u32 %v2298_v27, %v89_v21  ;;  %v95_v34 = vshrl.u32 %v2299_v29, %v89_v21  ;;  %v98_v35 = vshrl.u32 %v2300_v31, %v89_v21  ;;  %v101_v38 = vshrl.u32 %v2301_v36, %v89_v21 }
  0x90   :  { %v104_v40 = vshrl.u32 %v2302_v39, %v89_v21  ;;  %v2199_v44 = vadd.s32 4294967169, %v233_v23  ;;  %v90_v45 = vshrl.u32 %v2297_v25, %v89_v21  ;;  %vm109_vm4 = vcmp.lt.s32.totalorder %v87_v20, 4 }
  0x91   :  { %v93_v41 = vor.u32 %v92_v33, %v91_v26  ;;  %v96_v42 = vor.u32 %v95_v34, %v94_v28  ;;  %v99_v43 = vor.u32 %v98_v35, %v97_v30  ;;  %v102_v46 = vor.u32 %v101_v38, %v100_v32 }
  0x92   :  { %v105_v47 = vor.u32 %v104_v40, %v103_v37  ;;  %vm108_vm5 = vcmp.lt.s32.totalorder %v87_v20, 3  ;;  %v237_v53 = vor.u32 8388608, %v236_v24  ;;  %v239_v54 = vadd.s32 1, %v2199_v44 }
  0x93   :  { %v111_v48 = vsel %vm109_vm4, %v99_v43, 2102212464  ;;  %v114_v49 = vsel %vm106_vm2, %v93_v41, %v96_v42  ;;  %v118_v50 = vsel %vm106_vm2, %v96_v42, %v99_v43  ;;  %v115_v51 = vsel %vm109_vm4, %v102_v46, 920167782 }
  0x94   :  { %v119_v52 = vsel %vm109_vm4, %v105_v47, 1326507024  ;;  %v110_v55 = vsel %vm106_vm2, %v90_v45, %v93_v41  ;;  %v112_v56 = vsel %vm108_vm5, %v96_v42, %v111_v48  ;;  %v116_v57 = vsel %vm108_vm5, %v99_v43, %v115_v51 }
  0x95   :  { %v120_v58 = vsel %vm108_vm5, %v102_v46, %v119_v52  ;;  %v117_v59 = vsel %vm107_vm3, %v114_v49, %v116_v57  ;;  %vm240_vm6 = vcmp.gt.s32.totalorder %v239_v54, 0  ;;  %v2399_v2 = vsel %vm107_vm3, %v110_v55, %v112_v56 }
  0x96   :  { %v121_v60 = vsel %vm107_vm3, %v118_v50, %v120_v58  ;;  %v147_v0 = vand.u32 65535, %v117_v59  ;;  %v148_v1 = vshrl.u32 %v117_v59, 16  ;;  %v241_v8 = vsel %vm240_vm6, %v239_v54, 0 }
  0x97   :  { %v125_v62 = vand.u32 65535, %v121_v60  ;;  %v126_v63 = vshrl.u32 %v121_v60, 16  ;;  %v2401_v9 = vshll.u32 %v237_v53, 8  ;;  %v243_v32 = vand.u32 31, %v241_v8 }
  0x98   :  { %v150_v12 = vmul.u32 %v148_v1, %v123_v22  ;;  %v151_v13 = vmul.u32 %v147_v0, %v124_v61  ;;  %v149_v19 = vmul.u32 %v147_v0, %v123_v22  ;;  %v152_v21 = vmul.u32 %v148_v1, %v124_v61 }
  0x99   :  { %v128_v3 = vmul.u32 %v126_v63, %v123_v22  ;;  %v129_v4 = vmul.u32 %v125_v62, %v124_v61  ;;  %v127_v10 = vmul.u32 %v125_v62, %v123_v22  ;;  %v130_v11 = vmul.u32 %v126_v63, %v124_v61 }
  0x9a   :  { %v153_v26 = vshll.u32 %v150_v12, 16  ;;  %v154_v28 = vshrl.u32 %v150_v12, 16  ;;  %v155_v30 = vshll.u32 %v151_v13, 16  ;;  %v156_v34 = vshrl.u32 %v151_v13, 16 }
  0x9b   :  { %v131_v17 = vshll.u32 %v128_v3, 16  ;;  %v132_v18 = vshrl.u32 %v128_v3, 16  ;;  %v133_v23 = vshll.u32 %v129_v4, 16  ;;  %v134_v24 = vshrl.u32 %v129_v4, 16 }
  0x9c   :  { %vm157_vm8 = vc.u32 %v149_v19, %v153_v26  ;;  %v159_v35 = vadd.s32 %v153_v26, %v149_v19  ;;  %v2405_v40 = vsub.s32 32, %v243_v32  ;;  %v2408_v42 = vshrl.u32 %v241_v8, 5 }
  0x9d   :  { %vm135_vm7 = vc.u32 %v127_v10, %v131_v17  ;;  %v137_v20 = vadd.s32 %v131_v17, %v127_v10  ;;  %v158_v38 = vsel %vm157_vm8, 1, %v2296_v5  ;;  %v246_v46 = vshll.u32 %v2297_v25, %v243_v32 }
  0x9e   :  { %v136_v33 = vsel %vm135_vm7, 1, %v2296_v5  ;;  %v160_v41 = vadd.s32 %v158_v38, %v152_v21  ;;  %vm161_vm10 = vc.u32 %v159_v35, %v155_v30  ;;  %v2411_v45 = vadd.s32 %v159_v35, %v155_v30 }
  0x9f   :  { %v138_v37 = vadd.s32 %v136_v33, %v130_v11  ;;  %vm139_vm9 = vc.u32 %v137_v20, %v133_v23  ;;  %v162_v44 = vsel %vm161_vm10, 1, %v2296_v5  ;;  %v247_v48 = vshrl.u32 %v2298_v27, %v2405_v40  ;;  %v2463_v33 = vpop.f32.mrf.mxu0 }
  0xa0   :  { %v140_v22 = vsel %vm139_vm9, 1, %v2296_v5  ;;  %v164_v47 = vadd.s32 %v162_v44, %v160_v41  ;;  %v249_v49 = vshll.u32 %v2298_v27, %v243_v32  ;;  %v250_v50 = vshrl.u32 %v2299_v29, %v2405_v40 }
  0xa1   :  { %v142_v43 = vadd.s32 %v140_v22, %v138_v37  ;;  %v252_v52 = vshll.u32 %v2299_v29, %v243_v32  ;;  %v253_v53 = vshrl.u32 %v2300_v31, %v2405_v40  ;;  %v255_v54 = vshll.u32 %v2300_v31, %v243_v32 }
  0xa2   :  { %v165_v55 = vadd.s32 %v164_v47, %v154_v28  ;;  %v2423_v56 = vor.u32 %v247_v48, %v246_v46  ;;  %v2425_v57 = vor.u32 %v250_v50, %v249_v49  ;;  %v256_v58 = vshrl.u32 %v2301_v36, %v2405_v40 }
  0xa3   :  { %v143_v51 = vadd.s32 %v142_v43, %v132_v18  ;;  %v254_v60 = vor.u32 %v253_v53, %v252_v52  ;;  %v258_v61 = vshll.u32 %v2301_v36, %v243_v32  ;;  %v259_v62 = vshrl.u32 %v2302_v39, %v2405_v40 }
  0xa4   :  { %v166_v63 = vadd.s32 %v165_v55, %v156_v34  ;;  %v257_v0 = vor.u32 %v256_v58, %v255_v54  ;;  %v167_v1 = vmul.u32 %v2374_v15, %v2399_v2  ;;  %vm261_vm12 = vcmp.lt.s32.totalorder %v2408_v42, 1 }
  0xa5   :  { %v2429_v59 = vadd.s32 %v143_v51, %v134_v24  ;;  %v260_v3 = vor.u32 %v259_v62, %v258_v61  ;;  %vm264_vm13 = vcmp.lt.s32.totalorder %v2408_v42, 4  ;;  %v269_v8 = vsel %vm261_vm12, %v2423_v56, %v2425_v57 }
  0xa6   :  { %v170_v4 = vadd.s32 1, %v166_v63  ;;  %v278_v10 = vand.u32 65535, %v2401_v9  ;;  %vm263_vm14 = vcmp.lt.s32.totalorder %v2408_v42, 3  ;;  %v270_v15 = vsel %vm264_vm13, %v257_v0, 920167782 }
  0xa7   :  { %vm169_vm11 = vc.u32 %v2429_v59, %v2411_v45  ;;  %v273_v2 = vsel %vm261_vm12, %v2425_v57, %v254_v60  ;;  %v274_v11 = vsel %vm264_vm13, %v260_v3, 1326507024  ;;  %vm262_vm15 = vcmp.lt.s32.totalorder %v2408_v42, 2 }
  0xa8   :  { %v171_v12 = vsel %vm169_vm11, %v170_v4, %v166_v63  ;;  %v271_v13 = vsel %vm263_vm14, %v254_v60, %v270_v15  ;;  %v275_v17 = vsel %vm263_vm14, %v257_v0, %v274_v11  ;;  %v279_v23 = vshrl.u32 %v2401_v9, 16 }
  0xa9   :  { %v172_v18 = vadd.s32 %v171_v12, %v167_v1  ;;  %v272_v19 = vsel %vm262_vm15, %v269_v8, %v271_v13  ;;  %v276_v21 = vsel %vm262_vm15, %v273_v2, %v275_v17  ;;  %v387_v44 = vand.u32 2139095040, %v2463_v33 }
  0xaa   :  { %v280_v24 = vand.u32 65535, %v276_v21  ;;  %v281_v26 = vshrl.u32 %v276_v21, 16  ;;  %v302_v28 = vand.u32 65535, %v272_v19  ;;  %v303_v20 = vshrl.u32 %v272_v19, 16 }
  0xab   :  { %v173_v34 = vadd.s32 536870912, %v172_v18  ;;  %v266_v55 = vsel %vm264_vm13, %v254_v60, 2102212464  ;;  %v245_v1 = vshrl.u32 %v2297_v25, %v2405_v40  ;;  %v388_v8 = vshrl.u32 %v387_v44, 23 }
  0xac   :  { %v283_v30 = vmul.u32 %v281_v26, %v278_v10  ;;  %v284_v32 = vmul.u32 %v280_v24, %v279_v23  ;;  %v305_v35 = vmul.u32 %v303_v20, %v278_v10  ;;  %v306_v37 = vmul.u32 %v302_v28, %v279_v23 }
  0xad   :  { %v282_v38 = vmul.u32 %v280_v24, %v278_v10  ;;  %v285_v41 = vmul.u32 %v281_v26, %v279_v23  ;;  %v304_v48 = vmul.u32 %v302_v28, %v278_v10  ;;  %v2466_v49 = vshrl.u32 %v173_v34, 30 }
  0xae   :  { %v286_v22 = vshll.u32 %v283_v30, 16  ;;  %v308_v43 = vshll.u32 %v305_v35, 16  ;;  %v288_v46 = vshll.u32 %v284_v32, 16  ;;  %v307_v51 = vmul.u32 %v303_v20, %v279_v23 }
  0xaf   :  { %v310_v52 = vshll.u32 %v306_v37, 16  ;;  %v287_v62 = vshrl.u32 %v283_v30, 16  ;;  %v289_v3 = vshrl.u32 %v284_v32, 16  ;;  %v175_v10 = vshll.u32 %v2466_v49, 30 }
  0xb0   :  { %vm290_vm1 = vc.u32 %v282_v38, %v286_v22  ;;  %v292_v47 = vadd.s32 %v286_v22, %v282_v38  ;;  %vm312_vm3 = vc.u32 %v304_v48, %v308_v43  ;;  %v314_v54 = vadd.s32 %v308_v43, %v304_v48 }
  0xb1   :  { %v291_v50 = vsel %vm290_vm1, 1, %v2296_v5  ;;  %v313_v61 = vsel %vm312_vm3, 1, %v2296_v5  ;;  %v309_v2 = vshrl.u32 %v305_v35, 16  ;;  %v265_v11 = vsel %vm261_vm12, %v245_v1, %v2423_v56  ;;  %v2498_v35 = vpop.f32.mrf.mxu0 }
  0xb2   :  { %v293_v53 = vadd.s32 %v291_v50, %v285_v41  ;;  %vm294_vm2 = vc.u32 %v292_v47, %v288_v46  ;;  %v315_v0 = vadd.s32 %v313_v61, %v307_v51  ;;  %vm316_vm4 = vc.u32 %v314_v54, %v310_v52 }
  0xb3   :  { %v295_v58 = vsel %vm294_vm2, 1, %v2296_v5  ;;  %v317_v4 = vsel %vm316_vm4, 1, %v2296_v5  ;;  %v267_v12 = vsel %vm263_vm14, %v2425_v57, %v266_v55  ;;  %v2202_v13 = vadd.s32 4294967169, %v388_v8 }
  0xb4   :  { %v297_v63 = vadd.s32 %v295_v58, %v293_v53  ;;  %v319_v60 = vadd.s32 %v317_v4, %v315_v0  ;;  %v311_v40 = vshrl.u32 %v306_v37, 16  ;;  %v2485_v21 = vadd.s32 %v314_v54, %v310_v52 }
  0xb5   :  { %v394_v23 = vadd.s32 1, %v2202_v13  ;;  %v2487_v24 = vsub.s32 %v172_v18, %v175_v10  ;;  %v268_v26 = vsel %vm262_vm15, %v265_v11, %v267_v12  ;;  %v384_v56 = vand.u32 2147483647, %v2463_v33 }
  0xb6   :  { %v298_v15 = vadd.s32 %v297_v63, %v287_v62  ;;  %v320_v19 = vadd.s32 %v319_v60, %v309_v2  ;;  %v322_v20 = vmul.u32 %v2401_v9, %v268_v26  ;;  %v542_v41 = vand.u32 2139095040, %v2498_v35 }
  0xb7   :  { %vm395_vm6 = vcmp.gt.s32.totalorder %v394_v23, 0  ;;  %v178_v32 = vsub.s32 0, %v2487_v24  ;;  %v391_v18 = vand.u32 8388607, %v384_v56  ;;  %vm177_vm7 = vcmp.lt.s32.totalorder %v2487_v24, 0 }
  0xb8   :  { %v2483_v17 = vadd.s32 %v298_v15, %v289_v3  ;;  %v321_v28 = vadd.s32 %v320_v19, %v311_v40  ;;  %v396_v30 = vsel %vm395_vm6, %v394_v23, 0  ;;  %v543_v63 = vshrl.u32 %v542_v41, 23 }
  0xb9   :  { %v398_v37 = vand.u32 31, %v396_v30  ;;  %v179_v43 = vsel %vm177_vm7, %v178_v32, %v2487_v24  ;;  %v392_v9 = vor.u32 8388608, %v391_v18  ;;  %v2503_v44 = vshrl.u32 %v396_v30, 5 }
  0xba   :  { %vm324_vm5 = vc.u32 %v2483_v17, %v2485_v21  ;;  %v325_v57 = vadd.s32 1, %v321_v28  ;;  %v180_v8 = vclz %v179_v43  ;;  %v539_v11 = vand.u32 2147483647, %v2498_v35 }
  0xbb   :  { %v399_v22 = vsub.s32 32, %v398_v37  ;;  %v401_v46 = vshll.u32 %v2297_v25, %v398_v37  ;;  %v404_v50 = vshll.u32 %v2298_v27, %v398_v37  ;;  %v407_v52 = vshll.u32 %v2299_v29, %v398_v37 }
  0xbc   :  { %v326_v34 = vsel %vm324_vm5, %v325_v57, %v321_v28  ;;  %v410_v54 = vshll.u32 %v2300_v31, %v398_v37  ;;  %v413_v3 = vshll.u32 %v2301_v36, %v398_v37  ;;  %vm416_vm8 = vcmp.lt.s32.totalorder %v2503_v44, 1 }
  0xbd   :  { %v327_v42 = vadd.s32 %v326_v34, %v322_v20  ;;  %v402_v48 = vshrl.u32 %v2298_v27, %v399_v22  ;;  %v405_v51 = vshrl.u32 %v2299_v29, %v399_v22  ;;  %v408_v53 = vshrl.u32 %v2300_v31, %v399_v22 }
  0xbe   :  { %v411_v55 = vshrl.u32 %v2301_v36, %v399_v22  ;;  %v414_v4 = vshrl.u32 %v2302_v39, %v399_v22  ;;  %v2523_v2 = vshll.u32 %v392_v9, 8  ;;  %vm419_vm9 = vcmp.lt.s32.totalorder %v2503_v44, 4 }
  0xbf   :  { %v328_v38 = vadd.s32 536870912, %v327_v42  ;;  %v403_v61 = vor.u32 %v402_v48, %v401_v46  ;;  %v2516_v62 = vor.u32 %v405_v51, %v404_v50  ;;  %v409_v0 = vor.u32 %v408_v53, %v407_v52 }
  0xc0   :  { %v412_v1 = vor.u32 %v411_v55, %v410_v54  ;;  %v415_v15 = vor.u32 %v414_v4, %v413_v3  ;;  %vm418_vm10 = vcmp.lt.s32.totalorder %v2503_v44, 3  ;;  %v2205_v40 = vadd.s32 4294967169, %v543_v63 }
  0xc1   :  { %v2506_v47 = vshrl.u32 %v328_v38, 30  ;;  %v424_v60 = vsel %vm416_vm8, %v403_v61, %v2516_v62  ;;  %v428_v13 = vsel %vm416_vm8, %v2516_v62, %v409_v0  ;;  %v2197_v19 = vadd.s32 4294967294, %v180_v8 }
  0xc2   :  { %v425_v12 = vsel %vm419_vm9, %v412_v1, 920167782  ;;  %vm417_vm11 = vcmp.lt.s32.totalorder %v2503_v44, 2  ;;  %v429_v26 = vsel %vm419_vm9, %v415_v15, 1326507024  ;;  %v433_v30 = vand.u32 65535, %v2523_v2 }
  0xc3   :  { %v330_v58 = vshll.u32 %v2506_v47, 30  ;;  %v426_v23 = vsel %vm418_vm10, %v409_v0, %v425_v12  ;;  %v430_v20 = vsel %vm418_vm10, %v412_v1, %v429_v26  ;;  %v549_v41 = vadd.s32 1, %v2205_v40 }
  0xc4   :  { %v427_v57 = vsel %vm417_vm11, %v424_v60, %v426_v23  ;;  %v431_v32 = vsel %vm417_vm11, %v428_v13, %v430_v20  ;;  %v2553_v9 = vadd.s32 %v2411_v45, %v2429_v59  ;;  %vm2198_vm13 = vcmp.lt.s32.totalorder %v2197_v19, 0 }
  0xc5   :  { %v2520_v10 = vsub.s32 %v327_v42, %v330_v58  ;;  %v457_v34 = vand.u32 65535, %v427_v57  ;;  %v458_v18 = vshrl.u32 %v427_v57, 16  ;;  %v434_v42 = vshrl.u32 %v2523_v2, 16 }
  0xc6   :  { %v435_v37 = vand.u32 65535, %v431_v32  ;;  %v436_v38 = vshrl.u32 %v431_v32, 16  ;;  %v400_v51 = vshrl.u32 %v2297_v25, %v399_v22  ;;  %v2559_v58 = vand.u32 8388607, %v539_v11 }
  0xc7   :  { %v333_v28 = vsub.s32 0, %v2520_v10  ;;  %vm332_vm12 = vcmp.lt.s32.totalorder %v2520_v10, 0  ;;  %v460_v43 = vmul.u32 %v458_v18, %v433_v30  ;;  %v461_v52 = vmul.u32 %v457_v34, %v434_v42 }
  0xc8   :  { %v438_v48 = vmul.u32 %v436_v38, %v433_v30  ;;  %v439_v50 = vmul.u32 %v435_v37, %v434_v42  ;;  %v437_v54 = vmul.u32 %v435_v37, %v433_v30  ;;  %vm550_vm14 = vcmp.gt.s32.totalorder %v549_v41, 0 }
  0xc9   :  { %v334_v46 = vsel %vm332_vm12, %v333_v28, %v2520_v10  ;;  %v463_v53 = vshll.u32 %v460_v43, 16  ;;  %v420_v45 = vsel %vm416_vm8, %v400_v51, %v403_v61  ;;  %v421_v59 = vsel %vm419_vm9, %v409_v0, 2102212464 }
  0xca   :  { %v441_v55 = vshll.u32 %v438_v48, 16  ;;  %v335_v63 = vclz %v334_v46  ;;  %v459_v1 = vmul.u32 %v457_v34, %v433_v30  ;;  %v440_v3 = vmul.u32 %v436_v38, %v434_v42 }
  0xcb   :  { %v443_v4 = vshll.u32 %v439_v50, 16  ;;  %v465_v15 = vshll.u32 %v461_v52, 16  ;;  %v462_v13 = vmul.u32 %v458_v18, %v434_v42  ;;  %v551_v40 = vsel %vm550_vm14, %v549_v41, 0 }
  0xcc   :  { %vm445_vm15 = vc.u32 %v437_v54, %v441_v55  ;;  %v447_v22 = vadd.s32 %v441_v55, %v437_v54  ;;  %vm467_vm1 = vc.u32 %v459_v1, %v463_v53  ;;  %v469_v60 = vadd.s32 %v463_v53, %v459_v1 }
  0xcd   :  { %v446_v8 = vsel %vm445_vm15, 1, %v2296_v5  ;;  %v2200_v23 = vadd.s32 4294967294, %v335_v63  ;;  %v468_v0 = vsel %vm467_vm1, 1, %v2296_v5  ;;  %v422_v26 = vsel %vm418_vm10, %v2516_v62, %v421_v59 }
  0xce   :  { %v448_v12 = vadd.s32 %v446_v8, %v440_v3  ;;  %vm449_vm2 = vc.u32 %v447_v22, %v443_v4  ;;  %vm471_vm3 = vc.u32 %v469_v60, %v465_v15  ;;  %v442_v28 = vshrl.u32 %v438_v48, 16 }
  0xcf   :  { %v450_v61 = vsel %vm449_vm2, 1, %v2296_v5  ;;  %v470_v20 = vadd.s32 %v468_v0, %v462_v13  ;;  %v2573_v30 = vsel %vm2198_vm13, 0, %v2197_v19  ;;  %v472_v32 = vsel %vm471_vm3, 1, %v2296_v5 }
  0xd0   :  { %v452_v57 = vadd.s32 %v450_v61, %v448_v12  ;;  %v547_v34 = vor.u32 8388608, %v2559_v58  ;;  %v553_v18 = vand.u32 31, %v551_v40  ;;  %v444_v42 = vshrl.u32 %v439_v50, 16 }
  0xd1   :  { %v464_v38 = vshrl.u32 %v460_v43, 16  ;;  %v474_v41 = vadd.s32 %v472_v32, %v470_v20  ;;  %vm2201_vm4 = vcmp.lt.s32.totalorder %v2200_v23, 0  ;;  %v423_v46 = vsel %vm417_vm11, %v420_v45, %v422_v26 }
  0xd2   :  { %v453_v37 = vadd.s32 %v452_v57, %v442_v28  ;;  %v466_v62 = vshrl.u32 %v461_v52, 16  ;;  %v2579_v48 = vsub.s32 32, %v553_v18  ;;  %v2583_v19 = vadd.s32 %v469_v60, %v465_v15 }
  0xd3   :  { %v475_v53 = vadd.s32 %v474_v41, %v464_v38  ;;  %v556_v54 = vshll.u32 %v2297_v25, %v553_v18  ;;  %v559_v43 = vshll.u32 %v2298_v27, %v553_v18  ;;  %v2593_v58 = vshrl.u32 %v551_v40, 5 }
  0xd4   :  { %v2581_v51 = vadd.s32 %v453_v37, %v444_v42  ;;  %v557_v50 = vshrl.u32 %v2298_v27, %v2579_v48  ;;  %v560_v55 = vshrl.u32 %v2299_v29, %v2579_v48  ;;  %v563_v44 = vshrl.u32 %v2300_v31, %v2579_v48 }
  0xd5   :  { %v476_v52 = vadd.s32 %v475_v53, %v466_v62  ;;  %v562_v63 = vshll.u32 %v2299_v29, %v553_v18  ;;  %v565_v45 = vshll.u32 %v2300_v31, %v553_v18  ;;  %v566_v3 = vshrl.u32 %v2301_v36, %v2579_v48 }
  0xd6   :  { %vm479_vm5 = vc.u32 %v2581_v51, %v2583_v19  ;;  %v2599_v59 = vor.u32 %v557_v50, %v556_v54  ;;  %v2601_v1 = vor.u32 %v560_v55, %v559_v43  ;;  %v568_v8 = vshll.u32 %v2301_v36, %v553_v18 }
  0xd7   :  { %v480_v4 = vadd.s32 1, %v476_v52  ;;  %v2605_v22 = vor.u32 %v563_v44, %v562_v63  ;;  %v569_v15 = vshrl.u32 %v2302_v39, %v2579_v48  ;;  %v184_v60 = vsub.s32 32, %v2573_v30 }
  0xd8   :  { %v188_v12 = vsub.s32 4294967266, %v2573_v30  ;;  %v477_v13 = vmul.u32 %v2523_v2, %v423_v46  ;;  %v567_v40 = vor.u32 %v566_v3, %v565_v45  ;;  %vm571_vm6 = vcmp.lt.s32.totalorder %v2593_v58, 1 }
  0xd9   :  { %v481_v61 = vsel %vm479_vm5, %v480_v4, %v476_v52  ;;  %v570_v0 = vor.u32 %v569_v15, %v568_v8  ;;  %v2614_v26 = vshll.u32 %v547_v34, 8  ;;  %v2617_v28 = vsel %vm2201_vm4, 0, %v2200_v23 }
  0xda   :  { %v482_v57 = vadd.s32 %v481_v61, %v477_v13  ;;  %vm574_vm7 = vcmp.lt.s32.totalorder %v2593_v58, 4  ;;  %v579_v20 = vsel %vm571_vm6, %v2599_v59, %v2601_v1  ;;  %vm573_vm8 = vcmp.lt.s32.totalorder %v2593_v58, 3 }
  0xdb   :  { %v580_v2 = vsel %vm574_vm7, %v567_v40, 920167782  ;;  %v583_v32 = vsel %vm571_vm6, %v2601_v1, %v2605_v22  ;;  %v584_v23 = vsel %vm574_vm7, %v570_v0, 1326507024  ;;  %vm572_vm9 = vcmp.lt.s32.totalorder %v2593_v58, 2 }
  0xdc   :  { %v483_v34 = vadd.s32 536870912, %v482_v57  ;;  %v581_v18 = vsel %vm573_vm8, %v2605_v22, %v580_v2  ;;  %v585_v42 = vsel %vm573_vm8, %v567_v40, %v584_v23  ;;  %v2639_v37 = vadd.s32 127, %v188_v12 }
  0xdd   :  { %v343_v38 = vsub.s32 4294967266, %v2617_v28  ;;  %v582_v41 = vsel %vm572_vm9, %v579_v20, %v581_v18  ;;  %v586_v46 = vsel %vm572_vm9, %v583_v32, %v585_v42  ;;  %v588_v53 = vand.u32 65535, %v2614_v26 }
  0xde   :  { %v2646_v62 = vshrl.u32 %v483_v34, 30  ;;  %v590_v54 = vand.u32 65535, %v586_v46  ;;  %v591_v50 = vshrl.u32 %v586_v46, 16  ;;  %v589_v43 = vshrl.u32 %v2614_v26, 16 }
  0xdf   :  { %v612_v55 = vand.u32 65535, %v582_v41  ;;  %v613_v44 = vshrl.u32 %v582_v41, 16  ;;  %v2651_v52 = vshrl.u32 %v2553_v9, %v184_v60  ;;  %v323_v63 = vadd.s32 %v2485_v21, %v2483_v17 }
  0xe0   :  { %v485_v45 = vshll.u32 %v2646_v62, 30  ;;  %v593_v3 = vmul.u32 %v591_v50, %v588_v53  ;;  %v190_v4 = vshll.u32 %v2639_v37, 23  ;;  %v339_v8 = vsub.s32 32, %v2617_v28 }
  0xe1   :  { %v594_v15 = vmul.u32 %v590_v54, %v589_v43  ;;  %v615_v12 = vmul.u32 %v613_v44, %v588_v53  ;;  %v344_v13 = vadd.s32 127, %v343_v38  ;;  %v592_v61 = vmul.u32 %v590_v54, %v588_v53 }
  0xe2   :  { %v486_v40 = vsub.s32 %v482_v57, %v485_v45  ;;  %v596_v0 = vshll.u32 %v593_v3, 16  ;;  %v555_v9 = vshrl.u32 %v2297_v25, %v2579_v48  ;;  %v595_v60 = vmul.u32 %v591_v50, %v589_v43 }
  0xe3   :  { %v598_v20 = vshll.u32 %v594_v15, 16  ;;  %v616_v2 = vmul.u32 %v612_v55, %v589_v43  ;;  %v614_v23 = vmul.u32 %v612_v55, %v588_v53  ;;  %v617_v34 = vmul.u32 %v613_v44, %v589_v43 }
  0xe4   :  { %vm487_vm10 = vcmp.lt.s32.totalorder %v486_v40, 0  ;;  %v488_v17 = vsub.s32 0, %v486_v40  ;;  %vm600_vm11 = vc.u32 %v592_v61, %v596_v0  ;;  %v602_v21 = vadd.s32 %v596_v0, %v592_v61 }
  0xe5   :  { %v601_v32 = vsel %vm600_vm11, 1, %v2296_v5  ;;  %v618_v18 = vshll.u32 %v615_v12, 16  ;;  %v620_v57 = vshll.u32 %v616_v2, 16  ;;  %v576_v46 = vsel %vm574_vm7, %v2605_v22, 2102212464 }
  0xe6   :  { %v489_v42 = vsel %vm487_vm10, %v488_v17, %v486_v40  ;;  %v603_v37 = vadd.s32 %v601_v32, %v595_v60  ;;  %vm604_vm12 = vc.u32 %v602_v21, %v598_v20  ;;  %v597_v54 = vshrl.u32 %v593_v3, 16 }
  0xe7   :  { %v490_v38 = vclz %v489_v42  ;;  %v605_v41 = vsel %vm604_vm12, 1, %v2296_v5  ;;  %vm622_vm13 = vc.u32 %v614_v23, %v618_v18  ;;  %v624_v48 = vadd.s32 %v618_v18, %v614_v23 }
  0xe8   :  { %v607_v50 = vadd.s32 %v605_v41, %v603_v37  ;;  %v623_v45 = vsel %vm622_vm13, 1, %v2296_v5  ;;  %v345_v53 = vshll.u32 %v344_v13, 23  ;;  %v575_v44 = vsel %vm571_vm6, %v555_v9, %v2599_v59 }
  0xe9   :  { %v2203_v43 = vadd.s32 4294967294, %v490_v38  ;;  %v625_v55 = vadd.s32 %v623_v45, %v617_v34  ;;  %vm626_vm14 = vc.u32 %v624_v48, %v620_v57  ;;  %v599_v61 = vshrl.u32 %v594_v15, 16 }
  0xea   :  { %v608_v0 = vadd.s32 %v607_v50, %v597_v54  ;;  %v627_v60 = vsel %vm626_vm14, 1, %v2296_v5  ;;  %v577_v22 = vsel %vm573_vm8, %v2601_v1, %v576_v46  ;;  %v619_v3 = vshrl.u32 %v615_v12, 16 }
  0xeb   :  { %vm2204_vm15 = vcmp.lt.s32.totalorder %v2203_v43, 0  ;;  %v629_v20 = vadd.s32 %v627_v60, %v625_v55  ;;  %v341_v17 = vshrl.u32 %v323_v63, %v339_v8  ;;  %v478_v13 = vadd.s32 %v2583_v19, %v2581_v51 }
  0xec   :  { %v493_v21 = vsel %vm2204_vm15, 0, %v2203_v43  ;;  %v2675_v32 = vadd.s32 %v608_v0, %v599_v61  ;;  %v621_v15 = vshrl.u32 %v616_v2, 16  ;;  %v340_v34 = vshll.u32 %v2520_v10, %v2617_v28 }
  0xed   :  { %v494_v23 = vsub.s32 32, %v493_v21  ;;  %v498_v59 = vsub.s32 4294967266, %v493_v21  ;;  %v630_v9 = vadd.s32 %v629_v20, %v619_v3  ;;  %v346_v18 = vor.u32 4788187, %v345_v53 }
  0xee   :  { %v578_v1 = vsel %vm572_vm9, %v575_v44, %v577_v22  ;;  %v628_v12 = vadd.s32 %v624_v48, %v620_v57  ;;  %v495_v42 = vshll.u32 %v486_v40, %v493_v21  ;;  %v185_v51 = vshll.u32 %v2487_v24, %v2573_v30 }
  0xef   :  { %v496_v63 = vshrl.u32 %v478_v13, %v494_v23  ;;  %v499_v8 = vadd.s32 127, %v498_v59  ;;  %v631_v37 = vadd.s32 %v630_v9, %v621_v15  ;;  %v191_v19 = vor.u32 4788187, %v190_v4 }
  0xf0   :  { %vm634_vm1 = vc.u32 %v2675_v32, %v628_v12  ;;  %v342_v2 = vor.u32 %v341_v17, %v340_v34  ;;  %v187_v10 = vor.u32 %v2651_v52, %v185_v51  ;;  %v632_v58 = vmul.u32 %v2614_v26, %v578_v1 }
  0xf1   :  { %v497_v38 = vor.u32 %v496_v63, %v495_v42  ;;  %v500_v41 = vshll.u32 %v499_v8, 23  ;;  %v635_v46 = vadd.s32 1, %v631_v37  ;;  %v347_v28 = vand.u32 2147483647, %v346_v18 }
  0xf2   :  { %v192_v48 = vand.u32 2147483647, %v191_v19  ;;  %v349_v50 = vcvt.s32.f32 %v342_v2  ;;  %v194_v24 = vcvt.s32.f32 %v187_v10  ;;  %vm386_vm2 = vcmp.lt.s32.totalorder %v2463_v33, 0  ;;  %v700_v19 = vld [vmem:[%s3871_s3 + $0x10] sm:$0xff] }
  0xf3   :  { %v501_v57 = vor.u32 4788187, %v500_v41  ;;  %v636_v40 = vsel %vm634_vm1, %v635_v46, %v631_v37  ;;  %v504_v53 = vcvt.s32.f32 %v497_v38  ;;  %vm231_vm3 = vcmp.lt.s32.totalorder %v2372_v14, 0 }
  0xf4   :  { %v637_v54 = vadd.s32 %v636_v40, %v632_v58  ;;  %v350_v4 = vmul.f32 %v349_v50, %v347_v28  ;;  %v195_v55 = vmul.f32 %v194_v24, %v192_v48  ;;  %vm76_vm5 = vcmp.lt.s32.totalorder %v2366_v6, 0  ;;  %v2230_v24 = vld [vmem:[%s3871_s3 + $0x30] sm:$0xff] }
  0xf5   :  { %v502_v45 = vand.u32 2147483647, %v501_v57  ;;  %vm2698_vm6 = vcmp.le.f32.partialorder %v384_v56, 0.7853982  ;;  %vm2711_vm7 = vcmp.le.f32.partialorder %v229_v16, 0.7853982  ;;  %v633_v8 = vadd.s32 %v628_v12, %v2675_v32 }
  0xf6   :  { %v638_v30 = vadd.s32 536870912, %v637_v54  ;;  %v351_v0 = vxor.u32 2147483648, %v350_v4  ;;  %v196_v26 = vxor.u32 2147483648, %v195_v55  ;;  %v701_v56 = vld [vmem:[%s3871_s3 + $0x18] sm:$0xff]  ;;  %vm2720_vm8 = vcmp.le.f32.partialorder %v74_v7, 0.7853982 }
  0xf7   :  { %v505_v43 = vmul.f32 %v504_v53, %v502_v45  ;;  %719 = vperm.xlu0 %2265, %v701_v56   ;;  %vm2769_vm10 = vcmp.le.f32.partialorder %v539_v11, 0.7853982  ;;  %vm541_vm11 = vcmp.lt.s32.totalorder %v2498_v35, 0  ;;  %v198_v11 = vsub.s32 4, %v2466_v49 }
  0xf8   :  { %v2686_v44 = vshrl.u32 %v638_v30, 30  ;;  %v352_v20 = vsel %vm231_vm3, %v351_v0, %v350_v4  ;;  %v197_v13 = vsel %vm76_vm5, %v196_v26, %v195_v55  ;;  %v508_v55 = vsub.s32 4, %v2646_v62 }
  0xf9   :  { %v506_v61 = vxor.u32 2147483648, %v505_v43  ;;  %v2727_v34 = vsel %vm2711_vm7, %v2372_v14, %v352_v20  ;;  %v2732_v16 = vsel %vm2720_vm8, %v2366_v6, %v197_v13  ;;  %vm682_vm12 = vweird.f32 %v2498_v35 }
  0xfa   :  { %v640_v52 = vshll.u32 %v2686_v44, 30  ;;  %v2740_v7 = vmul.f32 %v2727_v34, %v2727_v34  ;;  %v2744_v42 = vmul.f32 %v2732_v16, %v2732_v16  ;;  %v509_v56 = vsel %vm386_vm2, %v508_v55, %v2646_v62 }
  0xfb   :  { %v507_v22 = vsel %vm386_vm2, %v506_v61, %v505_v43  ;;  %v699_v43 = vld [vmem:[%s3871_s3 + $0x8] sm:$0xff] }
  0xfc   :  { %v641_v60 = vsub.s32 %v637_v54, %v640_v52  ;;  %v2707_v21 = vsel %vm2698_vm6, %v2463_v33, %v507_v22  ;;  %v365_v10 = vmul.f32 -0.00019511016, %v2740_v7  ;;  %v210_v40 = vmul.f32 -0.00019511016, %v2744_v42  ;;  %709 = vperm.xlu1 %2266, %v699_v43  }
  0xfd   :  { %v2736_v18 = vmul.f32 %v2707_v21, %v2707_v21  ;;  %v358_v54 = vmul.f32 -0.001358992, %v2740_v7  ;;  %v203_v0 = vmul.f32 -0.001358992, %v2744_v42 }
  0xfe   :  { %vm642_vm4 = vcmp.lt.s32.totalorder %v641_v60, 0  ;;  %v643_v3 = vsub.s32 0, %v641_v60  ;;  %v366_v48 = vadd.f32 0.008332121, %v365_v10  ;;  %v211_v30 = vadd.f32 0.008332121, %v210_v40 }
  0xff   :  { %v520_v2 = vmul.f32 -0.00019511016, %v2736_v18  ;;  %714 = vperm.xlu0 %2265, %v700_v19   ;;  %v513_v32 = vmul.f32 -0.001358992, %v2736_v18  ;;  %v359_v26 = vadd.f32 0.041655596, %v358_v54 }
 0x100   :  { %v644_v23 = vsel %vm642_vm4, %v643_v3, %v641_v60  ;;  %v367_v52 = vmul.f32 %v366_v48, %v2740_v7  ;;  %v212_v20 = vmul.f32 %v211_v30, %v2744_v42  ;;  %v698_v19 = vld [vmem:[%s3871_s3] sm:$0xff] }
 0x101   :  { %v645_v15 = vclz %v644_v23  ;;  %v521_v57 = vadd.f32 0.008332121, %v520_v2  ;;  %v514_v4 = vadd.f32 0.041655596, %v513_v32  ;;  %v663_v23 = vsub.s32 4, %v2686_v44 }
 0x103   :  { %v2206_v1 = vadd.s32 4294967294, %v645_v15  ;;  %v522_v53 = vmul.f32 %v521_v57, %v2736_v18  ;;  %v515_v15 = vmul.f32 %v514_v4, %v2736_v18  ;;  %v664_v10 = vsel %vm541_vm11, %v663_v23, %v2686_v44 }
 0x104   :  { %704 = vperm.xlu1 %2266, %v698_v19  }
 0x105   :  { %vm2207_vm9 = vcmp.lt.s32.totalorder %v2206_v1, 0  ;;  %v523_v3 = vadd.f32 -0.16666654, %v522_v53  ;;  %v666_v53 = vsel %vm2769_vm10, 0, %v664_v10  ;;  %v2093_v10 = vld [vmem:[%s3872_s4 + $0x10] sm:$0xff] }
 0x106   :  { %v648_v63 = vsel %vm2207_vm9, 0, %v2206_v1 }
 0x107   :  { %v649_v37 = vsub.s32 32, %v648_v63  ;;  %v653_v51 = vsub.s32 4294967266, %v648_v63  ;;  %v650_v38 = vshll.u32 %v641_v60, %v648_v63  ;;  %1414 = vperm.xlu0 %2265, %v2230_v24   ;;  %v353_v60 = vsub.s32 4, %v2506_v47 }
 0x108   :  { %v368_v63 = vadd.f32 -0.16666654, %v367_v52 }
 0x109   :  { %v651_v41 = vshrl.u32 %v633_v8, %v649_v37  ;;  %v654_v46 = vadd.s32 127, %v653_v51  ;;  %v204_v8 = vadd.f32 0.041655596, %v203_v0  ;;  %v360_v51 = vmul.f32 %v359_v26, %v2740_v7  ;;  %v2231_v0 = vld [vmem:[%s3871_s3 + $0x38] sm:$0xff] }
 0x10a   :  { %v354_v62 = vsel %vm231_vm3, %v353_v60, %v2506_v47  ;;  %v369_v47 = vmul.f32 %v368_v63, %v2740_v7 }
 0x10b   :  { %v652_v58 = vor.u32 %v651_v41, %v650_v38  ;;  %v655_v28 = vshll.u32 %v654_v46, 23  ;;  %v524_v38 = vmul.f32 %v523_v3, %v2736_v18  ;;  %v213_v41 = vadd.f32 -0.16666654, %v212_v20  ;;  %v2092_v46 = vld [vmem:[%s3872_s4 + $0x8] sm:$0xff]  ;;  %v2160_v3 = vld [vmem:[%s3874_s6] sm:$0xff] }
 0x10c   :  { %v205_v32 = vmul.f32 %v204_v8, %v2744_v42  ;;  %v356_v48 = vsel %vm2711_vm7, 0, %v354_v62  ;;  %v361_v54 = vadd.f32 -0.4999988, %v360_v51  ;;  %v370_v55 = vadd.f32 1.0, %v369_v47  ;;  %1419 = vperm.xlu1 %2266, %v2231_v0  }
 0x10d   :  { %v656_v12 = vor.u32 4788187, %v655_v28  ;;  %v659_v45 = vcvt.s32.f32 %v652_v58  ;;  %v511_v58 = vsel %vm2698_vm6, 0, %v509_v56  ;;  %v516_v28 = vadd.f32 -0.4999988, %v515_v15 }
 0x10e   :  { %v528_v30 = vadd.s32 3, %v511_v58  ;;  %v362_v59 = vmul.f32 %v361_v54, %v2740_v7  ;;  %v683_v20 = vadd.s32 3, %v666_v53  ;;  %v371_v9 = vmul.f32 %v370_v55, %v2727_v34 }
 0x10f   :  { %v657_v50 = vand.u32 2147483647, %v656_v12  ;;  %v199_v12 = vsel %vm76_vm5, %v198_v11, %v2466_v49  ;;  %2102 = vperm.xlu0 %2265, %v2092_v46   ;;  %v517_v24 = vmul.f32 %v516_v28, %v2736_v18  ;;  %v206_v49 = vadd.f32 -0.4999988, %v205_v32 }
 0x110   :  { %v201_v52 = vsel %vm2720_vm8, 0, %v199_v12  ;;  %v529_v7 = vand.u32 3, %v528_v30  ;;  %v684_v62 = vand.u32 3, %v683_v20  ;;  %v377_v34 = vxor.u32 2147483648, %v371_v9 }
 0x111   :  { %v660_v61 = vmul.f32 %v659_v45, %v657_v50  ;;  %v525_v50 = vadd.f32 1.0, %v524_v38  ;;  %v214_v45 = vmul.f32 %v213_v41, %v2744_v42  ;;  %v518_v13 = vadd.f32 1.0, %v517_v24 }
 0x112   :  { %v207_v56 = vmul.f32 %v206_v49, %v2744_v42  ;;  %v218_v8 = vadd.s32 3, %v201_v52  ;;  %vm530_vm13 = vcmp.lt.s32.totalorder %v529_v7, 2  ;;  %vm531_vm14 = vcmp.eq.s32.totalorder %v529_v7, 0 }
 0x113   :  { %v661_v22 = vxor.u32 2147483648, %v660_v61  ;;  %v215_v18 = vadd.f32 1.0, %v214_v45  ;;  %v535_v38 = vxor.u32 2147483648, %v518_v13  ;;  %vm534_vm15 = vcmp.eq.s32.totalorder %v529_v7, 2 }
 0x114   :  { %v208_v46 = vadd.f32 1.0, %v207_v56  ;;  %v219_v42 = vand.u32 3, %v218_v8  ;;  %vm685_vm2 = vcmp.lt.s32.totalorder %v684_v62, 2  ;;  %vm686_vm3 = vcmp.eq.s32.totalorder %v684_v62, 0  ;;  %2107 = vperm.xlu1 %2266, %v2093_v10  }
 0x115   :  { %v662_v1 = vsel %vm541_vm11, %v661_v22, %v660_v61  ;;  %v373_v61 = vadd.s32 3, %v356_v48  ;;  %v526_v22 = vmul.f32 %v525_v50, %v2707_v21  ;;  %v216_v19 = vmul.f32 %v215_v18, %v2732_v16 }
 0x116   :  { %v665_v37 = vsel %vm2769_vm10, %v2498_v35, %v662_v1  ;;  %v363_v1 = vadd.f32 1.0, %v362_v59  ;;  %vm689_vm4 = vcmp.eq.s32.totalorder %v684_v62, 2  ;;  %v225_v12 = vxor.u32 2147483648, %v208_v46 }
 0x117   :  { %v667_v2 = vmul.f32 %v665_v37, %v665_v37  ;;  %v374_v63 = vand.u32 3, %v373_v61  ;;  %2163 = vperm.xlu0 %2265, %v2160_v3   ;;  %v532_v51 = vxor.u32 2147483648, %v526_v22  ;;  %vm221_vm6 = vcmp.eq.s32.totalorder %v219_v42, 0 }
 0x118   :  { %v380_v16 = vxor.u32 2147483648, %v363_v1  ;;  %vm527_vm8 = vweird.f32 %v2463_v33  ;;  %vm224_vm9 = vcmp.eq.s32.totalorder %v219_v42, 2  ;;  %vm220_vm10 = vcmp.lt.s32.totalorder %v219_v42, 2  ;;  %v694_v33 = vld [vmem:[%s3870_s2] sm:$0xff] }
 0x119   :  { %v675_v57 = vmul.f32 -0.00019511016, %v667_v2  ;;  %v668_v40 = vmul.f32 -0.001358992, %v667_v2  ;;  %vm376_vm1 = vcmp.eq.s32.totalorder %v374_v63, 0  ;;  %v533_v28 = vsel %vm531_vm14, %v518_v13, %v532_v51 }
 0x11a   :  { %v378_v32 = vsel %vm376_vm1, %v363_v1, %v377_v34  ;;  %vm379_vm5 = vcmp.eq.s32.totalorder %v374_v63, 2  ;;  %vm375_vm7 = vcmp.lt.s32.totalorder %v374_v63, 2  ;;  %v226_v24 = vsel %vm224_vm9, %v225_v12, %v216_v19 }
 0x11b   :  { %v676_v44 = vadd.f32 0.008332121, %v675_v57  ;;  %v669_v17 = vadd.f32 0.041655596, %v668_v40  ;;  %v222_v57 = vxor.u32 2147483648, %v216_v19  ;;  %v536_v40 = vsel %vm534_vm15, %v535_v38, %v526_v22 }
 0x11c   :  { %v537_v54 = vsel %vm530_vm13, %v533_v28, %v536_v40  ;;  %vm372_vm11 = vweird.f32 %v2372_v14  ;;  %vm722_vm13 = vcmask 261120   ;;  %v696_v14 = vld [vmem:[%s3870_s2 + $0x10] sm:$0xff] }
 0x11d   :  { %v677_v4 = vmul.f32 %v676_v44, %v667_v2  ;;  %v670_v43 = vmul.f32 %v669_v17, %v667_v2  ;;  %v381_v17 = vsel %vm379_vm5, %v380_v16, %v371_v9  ;;  %v223_v50 = vsel %vm221_vm6, %v208_v46, %v222_v57 }
 0x11e   :  { %v382_v45 = vsel %vm375_vm7, %v378_v32, %v381_v17  ;;  %v2837_v53 = vsel %vm527_vm8, nan, %v537_v54  ;;  %v227_v35 = vsel %vm220_vm10, %v223_v50, %v226_v24 }
 0x11f   :  { %v678_v26 = vadd.f32 -0.16666654, %v677_v4  ;;  %v671_v60 = vadd.f32 -0.4999988, %v670_v43  ;;  %v2842_v30 = vsel %vm372_vm11, nan, %v382_v45  ;;  %v697_v4 = vld [vmem:[%s3870_s2 + $0x18] sm:$0xff] }
 0x121   :  { %v679_v23 = vmul.f32 %v678_v26, %v667_v2  ;;  %v672_v15 = vmul.f32 %v671_v60, %v667_v2 }
 0x123   :  { %v680_v21 = vadd.f32 1.0, %v679_v23  ;;  %v673_v11 = vadd.f32 1.0, %v672_v15 }
 0x125   :  { %v681_v2 = vmul.f32 %v680_v21, %v665_v37  ;;  %v690_v41 = vxor.u32 2147483648, %v673_v11 }
 0x127   :  { %v687_v58 = vxor.u32 2147483648, %v681_v2  ;;  %v691_v47 = vsel %vm689_vm4, %v690_v41, %v681_v2 }
 0x129   :  { %v688_v37 = vsel %vm686_vm3, %v673_v11, %v687_v58 }
 0x12a   :  { %v692_v48 = vsel %vm685_vm2, %v688_v37, %v691_v47 }
 0x12b   :  { %v2832_v44 = vsel %vm682_vm12, nan, %v692_v48  ;;  %vm217_vm12 = vweird.f32 %v2366_v6  ;;  %v695_v6 = vld [vmem:[%s3870_s2 + $0x8] sm:$0xff] }
 0x12c   :  { %747 = vmatpush.msra.mxu1 %v2832_v44  ;;  %2249 = vmatpush.msra.mxu3 %v2832_v44  ;;  %v2853_v43 = vsel %vm217_vm12, nan, %v227_v35 }
 0x12e   :  { %748 = vmatpush.msra.mxu1 %v2837_v53  ;;  %2250 = vmatpush.msra.mxu3 %v2837_v53 }
 0x130   :  { %749 = vmatpush.msra.mxu1 %v2842_v30  ;;  %2251 = vmatpush.msra.mxu3 %v2842_v30 }
 0x132   :  { %750 = vmatpush.msra.mxu1 %v2853_v43  ;;  %2252 = vmatpush.msra.mxu3 %v2853_v43 }
 0x133   :  { %2208 = vmatmul.msk.f32.vlgmr.msra.gmra.mxu1 %vm722_vm13, %v694_v33  ;;  %2211 = vmatmul.msk.f32.vlgmr.msra.gmra.mxu3 %vm722_vm13, %v697_v4 }
 0x13b   :  { %2209 = vmatmul.msk.f32.gmra.mxu1 %vm722_vm13, %v695_v6 }
 0x143   :  { %2210 = vmatmul.msk.f32.gmra.mxu1 %vm722_vm13, %v696_v14 }
 0x169   :  { %v720_v28 = vpop.permute.xlu0 %719 }
 0x16e   :  { %v2867_v55 = vpop.permute.xlu1 %709 }
 0x176   :  { %v705_v49 = vpop.permute.xlu1 %704 }
 0x1b0   :  { %v752_v59 = vpop.f32.mrf.mxu1 }
 0x1b1   :  { %v2869_v61 = vadd.f32 %v752_v59, %v705_v49 }
 0x1b3   :  { %v767_v52 = vand.u32 2139095040, %v2869_v61  ;;  %v764_v60 = vand.u32 2147483647, %v2869_v61 }
 0x1b5   :  { %v768_v0 = vshrl.u32 %v767_v52, 23  ;;  %v771_v18 = vand.u32 8388607, %v764_v60 }
 0x1b6   :  { %v761_v42 = vpop.f32.mrf.mxu3 }
 0x1b7   :  { %v2212_v26 = vadd.s32 4294967169, %v768_v0  ;;  %v772_v7 = vor.u32 8388608, %v771_v18  ;;  %v2905_v47 = vadd.f32 %v761_v42, %v720_v28 }
 0x1b9   :  { %v774_v22 = vadd.s32 1, %v2212_v26  ;;  %v2888_v46 = vshll.u32 %v772_v7, 8  ;;  %v1232_v14 = vand.u32 2139095040, %v2905_v47  ;;  %v1229_v18 = vand.u32 2147483647, %v2905_v47 }
 0x1bb   :  { %vm775_vm14 = vcmp.gt.s32.totalorder %v774_v22, 0  ;;  %v813_v48 = vand.u32 65535, %v2888_v46  ;;  %v814_v54 = vshrl.u32 %v2888_v46, 16 }
 0x1bc   :  { %v776_v3 = vsel %vm775_vm14, %v774_v22, 0 }
 0x1bd   :  { %v778_v20 = vand.u32 31, %v776_v3  ;;  %v2875_v23 = vshrl.u32 %v776_v3, 5 }
 0x1bf   :  { %v779_v13 = vsub.s32 32, %v778_v20  ;;  %v781_v15 = vshll.u32 %v2297_v25, %v778_v20  ;;  %v784_v9 = vshll.u32 %v2298_v27, %v778_v20  ;;  %v787_v63 = vshll.u32 %v2299_v29, %v778_v20 }
 0x1c0   :  { %v790_v21 = vshll.u32 %v2300_v31, %v778_v20  ;;  %v793_v51 = vshll.u32 %v2301_v36, %v778_v20  ;;  %vm796_vm15 = vcmp.lt.s32.totalorder %v2875_v23, 1  ;;  %vm799_vm1 = vcmp.lt.s32.totalorder %v2875_v23, 4 }
 0x1c1   :  { %v782_v56 = vshrl.u32 %v2298_v27, %v779_v13  ;;  %v785_v1 = vshrl.u32 %v2299_v29, %v779_v13  ;;  %v788_v8 = vshrl.u32 %v2300_v31, %v779_v13  ;;  %v791_v11 = vshrl.u32 %v2301_v36, %v779_v13 }
 0x1c2   :  { %v794_v19 = vshrl.u32 %v2302_v39, %v779_v13  ;;  %vm798_vm2 = vcmp.lt.s32.totalorder %v2875_v23, 3  ;;  %vm797_vm3 = vcmp.lt.s32.totalorder %v2875_v23, 2  ;;  %v780_v35 = vshrl.u32 %v2297_v25, %v779_v13 }
 0x1c3   :  { %v783_v62 = vor.u32 %v782_v56, %v781_v15  ;;  %v786_v38 = vor.u32 %v785_v1, %v784_v9  ;;  %v789_v2 = vor.u32 %v788_v8, %v787_v63  ;;  %v792_v41 = vor.u32 %v791_v11, %v790_v21 }
 0x1c4   :  { %v795_v34 = vor.u32 %v794_v19, %v793_v51  ;;  %v1233_v56 = vshrl.u32 %v1232_v14, 23 }
 0x1c5   :  { %v804_v10 = vsel %vm796_vm15, %v783_v62, %v786_v38  ;;  %v808_v58 = vsel %vm796_vm15, %v786_v38, %v789_v2  ;;  %v805_v16 = vsel %vm799_vm1, %v792_v41, 920167782  ;;  %v801_v33 = vsel %vm799_vm1, %v789_v2, 2102212464 }
 0x1c6   :  { %v809_v57 = vsel %vm799_vm1, %v795_v34, 1326507024  ;;  %v806_v40 = vsel %vm798_vm2, %v789_v2, %v805_v16  ;;  %v800_v49 = vsel %vm796_vm15, %v780_v35, %v783_v62  ;;  %v802_v0 = vsel %vm798_vm2, %v786_v38, %v801_v33 }
 0x1c7   :  { %v810_v37 = vsel %vm798_vm2, %v792_v41, %v809_v57  ;;  %v807_v32 = vsel %vm797_vm3, %v804_v10, %v806_v40  ;;  %v2221_v51 = vadd.s32 4294967169, %v1233_v56  ;;  %v803_v42 = vsel %vm797_vm3, %v800_v49, %v802_v0  ;;  %v755_v40 = vpop.f32.mrf.mxu1 }
 0x1c8   :  { %v811_v12 = vsel %vm797_vm3, %v808_v58, %v810_v37  ;;  %v837_v45 = vand.u32 65535, %v807_v32  ;;  %v838_v24 = vshrl.u32 %v807_v32, 16  ;;  %v1236_v57 = vand.u32 8388607, %v1229_v18 }
 0x1c9   :  { %v815_v17 = vand.u32 65535, %v811_v12  ;;  %v816_v50 = vshrl.u32 %v811_v12, 16  ;;  %v1239_v34 = vadd.s32 1, %v2221_v51  ;;  %v857_v23 = vmul.u32 %v2888_v46, %v803_v42 }
 0x1ca   :  { %v840_v59 = vmul.u32 %v838_v24, %v813_v48  ;;  %v841_v52 = vmul.u32 %v837_v45, %v814_v54  ;;  %v839_v20 = vmul.u32 %v837_v45, %v813_v48  ;;  %v842_v13 = vmul.u32 %v838_v24, %v814_v54 }
 0x1cb   :  { %v818_v4 = vmul.u32 %v816_v50, %v813_v48  ;;  %v819_v6 = vmul.u32 %v815_v17, %v814_v54  ;;  %v817_v26 = vmul.u32 %v815_v17, %v813_v48  ;;  %v820_v3 = vmul.u32 %v816_v50, %v814_v54 }
 0x1cc   :  { %v843_v7 = vshll.u32 %v840_v59, 16  ;;  %v845_v63 = vshll.u32 %v841_v52, 16  ;;  %v844_v10 = vshrl.u32 %v840_v59, 16  ;;  %vm1240_vm8 = vcmp.gt.s32.totalorder %v1239_v34, 0 }
 0x1cd   :  { %v821_v22 = vshll.u32 %v818_v4, 16  ;;  %v823_v15 = vshll.u32 %v819_v6, 16  ;;  %v822_v38 = vshrl.u32 %v818_v4, 16  ;;  %v824_v28 = vshrl.u32 %v819_v6, 16 }
 0x1ce   :  { %vm847_vm5 = vc.u32 %v839_v20, %v843_v7  ;;  %v849_v8 = vadd.s32 %v843_v7, %v839_v20  ;;  %v846_v37 = vshrl.u32 %v841_v52, 16  ;;  %v1241_v12 = vsel %vm1240_vm8, %v1239_v34, 0 }
 0x1cf   :  { %vm825_vm4 = vc.u32 %v817_v26, %v821_v22  ;;  %v827_v9 = vadd.s32 %v821_v22, %v817_v26  ;;  %v848_v11 = vsel %vm847_vm5, 1, %v2296_v5  ;;  %v1243_v17 = vand.u32 31, %v1241_v12 }
 0x1d0   :  { %v826_v1 = vsel %vm825_vm4, 1, %v2296_v5  ;;  %v850_v62 = vadd.s32 %v848_v11, %v842_v13  ;;  %vm851_vm7 = vc.u32 %v849_v8, %v845_v63  ;;  %v2932_v54 = vadd.s32 %v849_v8, %v845_v63 }
 0x1d1   :  { %v828_v21 = vadd.s32 %v826_v1, %v820_v3  ;;  %vm829_vm6 = vc.u32 %v827_v9, %v823_v15  ;;  %v852_v41 = vsel %vm851_vm7, 1, %v2296_v5  ;;  %v2936_v45 = vadd.f32 %v755_v40, %v2867_v55 }
 0x1d2   :  { %v830_v19 = vsel %vm829_vm6, 1, %v2296_v5  ;;  %v854_v58 = vadd.s32 %v852_v41, %v850_v62  ;;  %v1237_v24 = vor.u32 8388608, %v1236_v57  ;;  %v1244_v35 = vsub.s32 32, %v1243_v17 }
 0x1d3   :  { %v832_v2 = vadd.s32 %v830_v19, %v828_v21  ;;  %v1246_v33 = vshll.u32 %v2297_v25, %v1243_v17  ;;  %v1249_v6 = vshll.u32 %v2298_v27, %v1243_v17  ;;  %v1252_v14 = vshll.u32 %v2299_v29, %v1243_v17 }
 0x1d4   :  { %v855_v32 = vadd.s32 %v854_v58, %v844_v10  ;;  %v1255_v49 = vshll.u32 %v2300_v31, %v1243_v17  ;;  %v2944_v59 = vshrl.u32 %v1241_v12, 5  ;;  %v1247_v46 = vshrl.u32 %v2298_v27, %v1244_v35 }
 0x1d5   :  { %v833_v16 = vadd.s32 %v832_v2, %v822_v38  ;;  %v1250_v55 = vshrl.u32 %v2299_v29, %v1244_v35  ;;  %v1253_v52 = vshrl.u32 %v2300_v31, %v1244_v35  ;;  %v1256_v26 = vshrl.u32 %v2301_v36, %v1244_v35 }
 0x1d6   :  { %v856_v50 = vadd.s32 %v855_v32, %v846_v37  ;;  %v1258_v22 = vshll.u32 %v2301_v36, %v1243_v17  ;;  %v1259_v3 = vshrl.u32 %v2302_v39, %v1244_v35  ;;  %v2952_v13 = vor.u32 %v1247_v46, %v1246_v33 }
 0x1d7   :  { %v2930_v48 = vadd.s32 %v833_v16, %v824_v28  ;;  %v2954_v7 = vor.u32 %v1250_v55, %v1249_v6  ;;  %v1254_v15 = vor.u32 %v1253_v52, %v1252_v14  ;;  %v1257_v9 = vor.u32 %v1256_v26, %v1255_v49 }
 0x1d8   :  { %v860_v4 = vadd.s32 1, %v856_v50  ;;  %v1260_v56 = vor.u32 %v1259_v3, %v1258_v22  ;;  %v922_v1 = vand.u32 2139095040, %v2936_v45  ;;  %vm1261_vm10 = vcmp.lt.s32.totalorder %v2944_v59, 1 }
 0x1d9   :  { %vm859_vm9 = vc.u32 %v2930_v48, %v2932_v54  ;;  %vm1264_vm11 = vcmp.lt.s32.totalorder %v2944_v59, 4  ;;  %v2959_v8 = vshll.u32 %v1237_v24, 8  ;;  %vm1263_vm12 = vcmp.lt.s32.totalorder %v2944_v59, 3 }
 0x1da   :  { %v861_v0 = vsel %vm859_vm9, %v860_v4, %v856_v50  ;;  %v1269_v21 = vsel %vm1261_vm10, %v2952_v13, %v2954_v7  ;;  %v1270_v11 = vsel %vm1264_vm11, %v1257_v9, 920167782  ;;  %v1273_v51 = vsel %vm1261_vm10, %v2954_v7, %v1254_v15 }
 0x1db   :  { %v862_v20 = vadd.s32 %v861_v0, %v857_v23  ;;  %vm1262_vm14 = vcmp.lt.s32.totalorder %v2944_v59, 2  ;;  %v1271_v19 = vsel %vm1263_vm12, %v1254_v15, %v1270_v11  ;;  %v1274_v62 = vsel %vm1264_vm11, %v1260_v56, 1326507024 }
 0x1dc   :  { %v1272_v38 = vsel %vm1262_vm14, %v1269_v21, %v1271_v19  ;;  %v1275_v2 = vsel %vm1263_vm12, %v1257_v9, %v1274_v62  ;;  %v923_v41 = vshrl.u32 %v922_v1, 23  ;;  %v1278_v42 = vand.u32 65535, %v2959_v8 }
 0x1dd   :  { %v863_v63 = vadd.s32 536870912, %v862_v20  ;;  %v1276_v34 = vsel %vm1262_vm14, %v1273_v51, %v1275_v2  ;;  %v1279_v10 = vshrl.u32 %v2959_v8, 16  ;;  %v1302_v58 = vand.u32 65535, %v1272_v38 }
 0x1de   :  { %v1280_v16 = vand.u32 65535, %v1276_v34  ;;  %v1281_v57 = vshrl.u32 %v1276_v34, 16  ;;  %v1303_v40 = vshrl.u32 %v1272_v38, 16  ;;  %v919_v50 = vand.u32 2147483647, %v2936_v45 }
 0x1df   :  { %v2984_v28 = vshrl.u32 %v863_v63, 30  ;;  %v1306_v12 = vmul.u32 %v1302_v58, %v1279_v10  ;;  %v2215_v23 = vadd.s32 4294967169, %v923_v41  ;;  %v1245_v33 = vshrl.u32 %v2297_v25, %v1244_v35 }
 0x1e0   :  { %v1283_v37 = vmul.u32 %v1281_v57, %v1278_v42  ;;  %v1284_v32 = vmul.u32 %v1280_v16, %v1279_v10  ;;  %v1305_v17 = vmul.u32 %v1303_v40, %v1278_v42  ;;  %v1282_v4 = vmul.u32 %v1280_v16, %v1278_v42 }
 0x1e1   :  { %v865_v24 = vshll.u32 %v2984_v28, 30  ;;  %v1285_v14 = vmul.u32 %v1281_v57, %v1279_v10  ;;  %v1304_v49 = vmul.u32 %v1302_v58, %v1278_v42  ;;  %v1307_v46 = vmul.u32 %v1303_v40, %v1279_v10 }
 0x1e2   :  { %v1286_v6 = vshll.u32 %v1283_v37, 16  ;;  %v1308_v55 = vshll.u32 %v1305_v17, 16  ;;  %v1288_v52 = vshll.u32 %v1284_v32, 16  ;;  %v1310_v26 = vshll.u32 %v1306_v12, 16 }
 0x1e3   :  { %v929_v9 = vadd.s32 1, %v2215_v23  ;;  %v1266_v56 = vsel %vm1264_vm11, %v1254_v15, 2102212464  ;;  %v2993_v63 = vsub.s32 %v862_v20, %v865_v24  ;;  %v1287_v51 = vshrl.u32 %v1283_v37, 16 }
 0x1e4   :  { %vm1290_vm15 = vc.u32 %v1282_v4, %v1286_v6  ;;  %v1292_v0 = vadd.s32 %v1286_v6, %v1282_v4  ;;  %vm1312_vm1 = vc.u32 %v1304_v49, %v1308_v55  ;;  %v1314_v3 = vadd.s32 %v1308_v55, %v1304_v49 }
 0x1e5   :  { %v1291_v22 = vsel %vm1290_vm15, 1, %v2296_v5  ;;  %v1313_v35 = vsel %vm1312_vm1, 1, %v2296_v5  ;;  %vm930_vm4 = vcmp.gt.s32.totalorder %v929_v9, 0  ;;  %v1309_v38 = vshrl.u32 %v1305_v17, 16 }
 0x1e6   :  { %v1293_v1 = vadd.s32 %v1291_v22, %v1285_v14  ;;  %vm1294_vm2 = vc.u32 %v1292_v0, %v1288_v52  ;;  %v1315_v11 = vadd.s32 %v1313_v35, %v1307_v46  ;;  %vm1316_vm3 = vc.u32 %v1314_v3, %v1310_v26 }
 0x1e7   :  { %v1295_v21 = vsel %vm1294_vm2, 1, %v2296_v5  ;;  %v1317_v62 = vsel %vm1316_vm3, 1, %v2296_v5  ;;  %v926_v15 = vand.u32 8388607, %v919_v50  ;;  %v931_v41 = vsel %vm930_vm4, %v929_v9, 0 }
 0x1e8   :  { %v1297_v19 = vadd.s32 %v1295_v21, %v1293_v1  ;;  %v1319_v2 = vadd.s32 %v1317_v62, %v1315_v11  ;;  %v1265_v20 = vsel %vm1261_vm10, %v1245_v33, %v2952_v13  ;;  %v1267_v34 = vsel %vm1263_vm12, %v2954_v7, %v1266_v56 }
 0x1e9   :  { %v1289_v42 = vshrl.u32 %v1284_v32, 16  ;;  %v1311_v58 = vshrl.u32 %v1306_v12, 16  ;;  %v933_v57 = vand.u32 31, %v931_v41  ;;  %v868_v40 = vsub.s32 0, %v2993_v63 }
 0x1ea   :  { %v1298_v10 = vadd.s32 %v1297_v19, %v1287_v51  ;;  %v1320_v16 = vadd.s32 %v1319_v2, %v1309_v38  ;;  %v1318_v17 = vadd.s32 %v1314_v3, %v1310_v26  ;;  %vm867_vm5 = vcmp.lt.s32.totalorder %v2993_v63, 0 }
 0x1eb   :  { %v1268_v23 = vsel %vm1262_vm14, %v1265_v20, %v1267_v34  ;;  %v934_v13 = vsub.s32 32, %v933_v57  ;;  %v927_v33 = vor.u32 8388608, %v926_v15  ;;  %v936_v7 = vshll.u32 %v2297_v25, %v933_v57 }
 0x1ec   :  { %v1299_v37 = vadd.s32 %v1298_v10, %v1289_v42  ;;  %v1321_v24 = vadd.s32 %v1320_v16, %v1311_v58  ;;  %v869_v6 = vsel %vm867_vm5, %v868_v40, %v2993_v63  ;;  %v1322_v14 = vmul.u32 %v2959_v8, %v1268_v23 }
 0x1ed   :  { %v937_v32 = vshrl.u32 %v2298_v27, %v934_v13  ;;  %v940_v12 = vshrl.u32 %v2299_v29, %v934_v13  ;;  %v939_v49 = vshll.u32 %v2298_v27, %v933_v57  ;;  %v943_v59 = vshrl.u32 %v2300_v31, %v934_v13 }
 0x1ee   :  { %vm1324_vm6 = vc.u32 %v1299_v37, %v1318_v17  ;;  %v1325_v4 = vadd.s32 1, %v1321_v24  ;;  %v3016_v55 = vshrl.u32 %v931_v41, 5  ;;  %v942_v0 = vshll.u32 %v2299_v29, %v933_v57 }
 0x1ef   :  { %v938_v52 = vor.u32 %v937_v32, %v936_v7  ;;  %v3019_v22 = vor.u32 %v940_v12, %v939_v49  ;;  %v945_v3 = vshll.u32 %v2300_v31, %v933_v57  ;;  %v946_v9 = vshrl.u32 %v2301_v36, %v934_v13  ;;  %v715_v12 = vpop.permute.xlu0 %714 }
 0x1f0   :  { %v1326_v46 = vsel %vm1324_vm6, %v1325_v4, %v1321_v24  ;;  %v944_v56 = vor.u32 %v943_v59, %v942_v0  ;;  %v948_v8 = vshll.u32 %v2301_v36, %v933_v57  ;;  %v949_v1 = vshrl.u32 %v2302_v39, %v934_v13  ;;  %v758_v24 = vpop.f32.mrf.mxu1 }
 0x1f1   :  { %v1327_v26 = vadd.s32 %v1326_v46, %v1322_v14  ;;  %v870_v35 = vclz %v869_v6  ;;  %v947_v11 = vor.u32 %v946_v9, %v945_v3  ;;  %vm951_vm7 = vcmp.lt.s32.totalorder %v3016_v55, 1 }
 0x1f2   :  { %v950_v51 = vor.u32 %v949_v1, %v948_v8  ;;  %vm954_vm8 = vcmp.lt.s32.totalorder %v3016_v55, 4  ;;  %v3027_v19 = vshll.u32 %v927_v33, 8  ;;  %vm953_vm9 = vcmp.lt.s32.totalorder %v3016_v55, 3 }
 0x1f3   :  { %v1328_v21 = vadd.s32 536870912, %v1327_v26  ;;  %v959_v38 = vsel %vm951_vm7, %v938_v52, %v3019_v22  ;;  %v960_v2 = vsel %vm954_vm8, %v947_v11, 920167782  ;;  %v963_v41 = vsel %vm951_vm7, %v3019_v22, %v944_v56 }
 0x1f4   :  { %v961_v15 = vsel %vm953_vm9, %v944_v56, %v960_v2  ;;  %v964_v20 = vsel %vm954_vm8, %v950_v51, 1326507024  ;;  %vm952_vm10 = vcmp.lt.s32.totalorder %v3016_v55, 2  ;;  %v3046_v42 = vadd.s32 4294967294, %v870_v35 }
 0x1f5   :  { %v3029_v62 = vshrl.u32 %v1328_v21, 30  ;;  %v962_v10 = vsel %vm952_vm10, %v959_v38, %v961_v15  ;;  %v965_v58 = vsel %vm953_vm9, %v947_v11, %v964_v20  ;;  %v968_v40 = vand.u32 65535, %v3027_v19 }
 0x1f6   :  { %v966_v57 = vsel %vm952_vm10, %v963_v41, %v965_v58  ;;  %v969_v23 = vshrl.u32 %v3027_v19, 16  ;;  %v992_v7 = vand.u32 65535, %v962_v10  ;;  %v993_v32 = vshrl.u32 %v962_v10, 16 }
 0x1f7   :  { %v1330_v34 = vshll.u32 %v3029_v62, 30  ;;  %v970_v33 = vand.u32 65535, %v966_v57  ;;  %v971_v4 = vshrl.u32 %v966_v57, 16  ;;  %v935_v14 = vshrl.u32 %v2297_v25, %v934_v13 }
 0x1f8   :  { %v1323_v49 = vadd.s32 %v1318_v17, %v1299_v37  ;;  %v3061_v0 = vadd.f32 %v758_v24, %v715_v12  ;;  %v995_v9 = vmul.u32 %v993_v32, %v968_v40  ;;  %v996_v8 = vmul.u32 %v992_v7, %v969_v23 }
 0x1f9   :  { %v3052_v16 = vsub.s32 %v1327_v26, %v1330_v34  ;;  %v973_v59 = vmul.u32 %v971_v4, %v968_v40  ;;  %v974_v46 = vmul.u32 %v970_v33, %v969_v23  ;;  %v955_v3 = vsel %vm951_vm7, %v935_v14, %v938_v52 }
 0x1fa   :  { %vm2214_vm12 = vcmp.lt.s32.totalorder %v3046_v42, 0  ;;  %v956_v35 = vsel %vm954_vm8, %v944_v56, 2102212464  ;;  %v972_v21 = vmul.u32 %v970_v33, %v968_v40  ;;  %v975_v37 = vmul.u32 %v971_v4, %v969_v23 }
 0x1fb   :  { %vm1332_vm11 = vcmp.lt.s32.totalorder %v3052_v16, 0  ;;  %v1333_v6 = vsub.s32 0, %v3052_v16  ;;  %v976_v13 = vshll.u32 %v973_v59, 16  ;;  %v978_v17 = vshll.u32 %v974_v46, 16 }
 0x1fc   :  { %v994_v11 = vmul.u32 %v992_v7, %v968_v40  ;;  %v998_v51 = vshll.u32 %v995_v9, 16  ;;  %v997_v15 = vmul.u32 %v993_v32, %v969_v23  ;;  %v1000_v41 = vshll.u32 %v996_v8, 16 }
 0x1fd   :  { %v1334_v26 = vsel %vm1332_vm11, %v1333_v6, %v3052_v16  ;;  %vm980_vm14 = vc.u32 %v972_v21, %v976_v13  ;;  %v982_v2 = vadd.s32 %v976_v13, %v972_v21  ;;  %v977_v33 = vshrl.u32 %v973_v59, 16 }
 0x1fe   :  { %v1335_v1 = vclz %v1334_v26  ;;  %v981_v52 = vsel %vm980_vm14, 1, %v2296_v5  ;;  %vm1002_vm15 = vc.u32 %v994_v11, %v998_v51  ;;  %v1004_v20 = vadd.s32 %v998_v51, %v994_v11 }
 0x1ff   :  { %v983_v34 = vadd.s32 %v981_v52, %v975_v37  ;;  %vm984_vm2 = vc.u32 %v982_v2, %v978_v17  ;;  %v1003_v56 = vsel %vm1002_vm15, 1, %v2296_v5  ;;  %v957_v23 = vsel %vm953_vm9, %v3019_v22, %v956_v35 }
 0x200   :  { %v2222_v38 = vadd.s32 4294967294, %v1335_v1  ;;  %v985_v58 = vsel %vm984_vm2, 1, %v2296_v5  ;;  %v1005_v57 = vadd.s32 %v1003_v56, %v997_v15  ;;  %vm1006_vm3 = vc.u32 %v1004_v20, %v1000_v41 }
 0x201   :  { %v987_v4 = vadd.s32 %v985_v58, %v983_v34  ;;  %v979_v7 = vshrl.u32 %v974_v46, 16  ;;  %v1007_v32 = vsel %vm1006_vm3, 1, %v2296_v5  ;;  %v1077_v12 = vand.u32 2139095040, %v3061_v0 }
 0x202   :  { %vm2223_vm1 = vcmp.lt.s32.totalorder %v2222_v38, 0  ;;  %v999_v26 = vshrl.u32 %v995_v9, 16  ;;  %v1009_v1 = vadd.s32 %v1007_v32, %v1005_v57  ;;  %v1001_v21 = vshrl.u32 %v996_v8, 16 }
 0x203   :  { %v1338_v10 = vsel %vm2223_vm1, 0, %v2222_v38  ;;  %v988_v14 = vadd.s32 %v987_v4, %v977_v33  ;;  %v1078_v13 = vshrl.u32 %v1077_v12, 23  ;;  %v3082_v22 = vsel %vm2214_vm12, 0, %v3046_v42 }
 0x204   :  { %v1339_v40 = vsub.s32 32, %v1338_v10  ;;  %v1343_v24 = vsub.s32 4294967266, %v1338_v10  ;;  %v1010_v59 = vadd.s32 %v1009_v1, %v999_v26  ;;  %v958_v46 = vsel %vm952_vm10, %v955_v3, %v957_v23 }
 0x205   :  { %v3077_v11 = vadd.s32 %v988_v14, %v979_v7  ;;  %v3086_v35 = vadd.s32 %v1004_v20, %v1000_v41  ;;  %v2218_v51 = vadd.s32 4294967169, %v1078_v13  ;;  %v1340_v9 = vshll.u32 %v3052_v16, %v1338_v10 }
 0x206   :  { %v1344_v6 = vadd.s32 127, %v1343_v24  ;;  %v1341_v37 = vshrl.u32 %v1323_v49, %v1339_v40  ;;  %v1011_v38 = vadd.s32 %v1010_v59, %v1001_v21  ;;  %v1074_v49 = vand.u32 2147483647, %v3061_v0 }
 0x207   :  { %vm1014_vm4 = vc.u32 %v3077_v11, %v3086_v35  ;;  %v1084_v2 = vadd.s32 1, %v2218_v51  ;;  %v878_v42 = vsub.s32 4294967266, %v3082_v22  ;;  %v1012_v55 = vmul.u32 %v3027_v19, %v958_v46 }
 0x208   :  { %v1345_v17 = vshll.u32 %v1344_v6, 23  ;;  %v1342_v15 = vor.u32 %v1341_v37, %v1340_v9  ;;  %v1015_v52 = vadd.s32 1, %v1011_v38  ;;  %v1081_v16 = vand.u32 8388607, %v1074_v49 }
 0x209   :  { %vm1085_vm5 = vcmp.gt.s32.totalorder %v1084_v2, 0  ;;  %v858_v58 = vadd.s32 %v2932_v54, %v2930_v48  ;;  %v879_v57 = vadd.s32 127, %v878_v42  ;;  %vm1231_vm6 = vcmp.lt.s32.totalorder %v2905_v47, 0 }
 0x20a   :  { %v1346_v8 = vor.u32 4788187, %v1345_v17  ;;  %v1016_v41 = vsel %vm1014_vm4, %v1015_v52, %v1011_v38  ;;  %v1086_v20 = vsel %vm1085_vm5, %v1084_v2, 0  ;;  %v1349_v10 = vcvt.s32.f32 %v1342_v15 }
 0x20b   :  { %v1017_v34 = vadd.s32 %v1016_v41, %v1012_v55  ;;  %v1088_v56 = vand.u32 31, %v1086_v20  ;;  %v1082_v4 = vor.u32 8388608, %v1081_v16  ;;  %v3100_v19 = vshrl.u32 %v1086_v20, 5 }
 0x20c   :  { %v1347_v3 = vand.u32 2147483647, %v1346_v8  ;;  %v874_v17 = vsub.s32 32, %v3082_v22  ;;  %vm3130_vm7 = vcmp.le.f32.partialorder %v1229_v18, 0.7853982  ;;  %v880_v15 = vshll.u32 %v879_v57, 23 }
 0x20d   :  { %v1018_v40 = vadd.s32 536870912, %v1017_v34  ;;  %v3098_v24 = vsub.s32 32, %v1088_v56  ;;  %v1091_v23 = vshll.u32 %v2297_v25, %v1088_v56  ;;  %v1094_v12 = vshll.u32 %v2298_v27, %v1088_v56 }
 0x20e   :  { %v1350_v33 = vmul.f32 %v1349_v10, %v1347_v3  ;;  %v1097_v6 = vshll.u32 %v2299_v29, %v1088_v56  ;;  %v1100_v14 = vshll.u32 %v2300_v31, %v1088_v56  ;;  %v1103_v13 = vshll.u32 %v2301_v36, %v1088_v56 }
 0x20f   :  { %v3103_v7 = vshrl.u32 %v1018_v40, 30  ;;  %v1092_v32 = vshrl.u32 %v2298_v27, %v3098_v24  ;;  %v1095_v48 = vshrl.u32 %v2299_v29, %v3098_v24  ;;  %v1098_v54 = vshrl.u32 %v2300_v31, %v3098_v24 }
 0x210   :  { %v1101_v26 = vshrl.u32 %v2301_v36, %v3098_v24  ;;  %v1104_v37 = vshrl.u32 %v2302_v39, %v3098_v24  ;;  %vm1106_vm8 = vcmp.lt.s32.totalorder %v3100_v19, 1  ;;  %v3137_v2 = vshll.u32 %v1082_v4, 8 }
 0x211   :  { %v1020_v1 = vshll.u32 %v3103_v7, 30  ;;  %v3118_v21 = vor.u32 %v1092_v32, %v1091_v23  ;;  %v3124_v59 = vor.u32 %v1095_v48, %v1094_v12  ;;  %v3126_v46 = vor.u32 %v1098_v54, %v1097_v6 }
 0x212   :  { %v1102_v51 = vor.u32 %v1101_v26, %v1100_v14  ;;  %v1105_v38 = vor.u32 %v1104_v37, %v1103_v13  ;;  %v1351_v52 = vxor.u32 2147483648, %v1350_v33  ;;  %vm1109_vm9 = vcmp.lt.s32.totalorder %v3100_v19, 4 }
 0x213   :  { %v3134_v8 = vsub.s32 %v1017_v34, %v1020_v1  ;;  %v1114_v42 = vsel %vm1106_vm8, %v3118_v21, %v3124_v59  ;;  %vm1108_vm11 = vcmp.lt.s32.totalorder %v3100_v19, 3  ;;  %vm1107_vm12 = vcmp.lt.s32.totalorder %v3100_v19, 2 }
 0x214   :  { %v1115_v55 = vsel %vm1109_vm9, %v1102_v51, 920167782  ;;  %v1118_v41 = vsel %vm1106_vm8, %v3124_v59, %v3126_v46  ;;  %v1119_v16 = vsel %vm1109_vm9, %v1105_v38, 1326507024  ;;  %v1123_v10 = vand.u32 65535, %v3137_v2 }
 0x215   :  { %vm1022_vm10 = vcmp.lt.s32.totalorder %v3134_v8, 0  ;;  %v1023_v18 = vsub.s32 0, %v3134_v8  ;;  %v1116_v3 = vsel %vm1108_vm11, %v3126_v46, %v1115_v55  ;;  %v1120_v56 = vsel %vm1108_vm11, %v1102_v51, %v1119_v16 }
 0x216   :  { %v1117_v34 = vsel %vm1107_vm12, %v1114_v42, %v1116_v3  ;;  %v1121_v40 = vsel %vm1107_vm12, %v1118_v41, %v1120_v56  ;;  %v1352_v32 = vsel %vm1231_vm6, %v1351_v52, %v1350_v33  ;;  %v1124_v12 = vshrl.u32 %v3137_v2, 16 }
 0x217   :  { %v1024_v20 = vsel %vm1022_vm10, %v1023_v18, %v3134_v8  ;;  %v1147_v4 = vand.u32 65535, %v1117_v34  ;;  %v1148_v23 = vshrl.u32 %v1117_v34, 16  ;;  %v1125_v6 = vand.u32 65535, %v1121_v40 }
 0x218   :  { %v1025_v57 = vclz %v1024_v20  ;;  %v1126_v48 = vshrl.u32 %v1121_v40, 16  ;;  %v875_v54 = vshll.u32 %v2993_v63, %v3082_v22  ;;  %v876_v14 = vshrl.u32 %v858_v58, %v874_v17 }
 0x219   :  { %v1150_v1 = vmul.u32 %v1148_v23, %v1123_v10  ;;  %v3172_v13 = vor.u32 4788187, %v880_v15  ;;  %v1129_v51 = vmul.u32 %v1125_v6, %v1124_v12  ;;  %v1151_v38 = vmul.u32 %v1147_v4, %v1124_v12 }
 0x21a   :  { %v2216_v26 = vadd.s32 4294967294, %v1025_v57  ;;  %v1128_v37 = vmul.u32 %v1126_v48, %v1123_v10  ;;  %v3177_v42 = vsel %vm3130_vm7, %v2905_v47, %v1352_v32  ;;  %v1013_v33 = vadd.s32 %v3086_v35, %v3077_v11 }
 0x21b   :  { %v1153_v52 = vshll.u32 %v1150_v1, 16  ;;  %v1127_v63 = vmul.u32 %v1125_v6, %v1123_v10  ;;  %v1149_v58 = vmul.u32 %v1147_v4, %v1123_v10  ;;  %v1130_v55 = vmul.u32 %v1126_v48, %v1124_v12 }
 0x21c   :  { %vm2217_vm14 = vcmp.lt.s32.totalorder %v2216_v26, 0  ;;  %v1131_v22 = vshll.u32 %v1128_v37, 16  ;;  %v1152_v3 = vmul.u32 %v1148_v23, %v1124_v12  ;;  %v1133_v41 = vshll.u32 %v1129_v51, 16 }
 0x21d   :  { %v1028_v18 = vsel %vm2217_vm14, 0, %v2216_v26  ;;  %v1155_v20 = vshll.u32 %v1151_v38, 16  ;;  %vm1157_vm1 = vc.u32 %v1149_v58, %v1153_v52  ;;  %v1159_v40 = vadd.s32 %v1153_v52, %v1149_v58 }
 0x21e   :  { %v1029_v17 = vsub.s32 32, %v1028_v18  ;;  %v1033_v15 = vsub.s32 4294967266, %v1028_v18  ;;  %vm1135_vm15 = vc.u32 %v1127_v63, %v1131_v22  ;;  %v1137_v16 = vadd.s32 %v1131_v22, %v1127_v63 }
 0x21f   :  { %v1136_v57 = vsel %vm1135_vm15, 1, %v2296_v5  ;;  %v1158_v35 = vsel %vm1157_vm1, 1, %v2296_v5  ;;  %v1111_v10 = vsel %vm1109_vm9, %v3126_v46, 2102212464  ;;  %v1030_v12 = vshll.u32 %v3134_v8, %v1028_v18 }
 0x220   :  { %v1031_v34 = vshrl.u32 %v1013_v33, %v1029_v17  ;;  %v1034_v56 = vadd.s32 127, %v1033_v15  ;;  %v1138_v11 = vadd.s32 %v1136_v57, %v1130_v55  ;;  %vm1139_vm2 = vc.u32 %v1137_v16, %v1133_v41 }
 0x221   :  { %v1140_v4 = vsel %vm1139_vm2, 1, %v2296_v5  ;;  %v1160_v23 = vadd.s32 %v1158_v35, %v1152_v3  ;;  %v1132_v6 = vshrl.u32 %v1128_v37, 16  ;;  %vm1161_vm3 = vc.u32 %v1159_v40, %v1155_v20 }
 0x222   :  { %v1035_v32 = vshll.u32 %v1034_v56, 23  ;;  %v1142_v48 = vadd.s32 %v1140_v4, %v1138_v11  ;;  %v1090_v33 = vshrl.u32 %v2297_v25, %v3098_v24  ;;  %v1154_v63 = vshrl.u32 %v1150_v1, 16 }
 0x223   :  { %v1162_v52 = vsel %vm1161_vm3, 1, %v2296_v5  ;;  %v1032_v22 = vor.u32 %v1031_v34, %v1030_v12  ;;  %v1134_v58 = vshrl.u32 %v1129_v51, 16  ;;  %v877_v46 = vor.u32 %v876_v14, %v875_v54 }
 0x224   :  { %v1036_v26 = vor.u32 4788187, %v1035_v32  ;;  %v1143_v17 = vadd.s32 %v1142_v48, %v1132_v6  ;;  %v1164_v15 = vadd.s32 %v1162_v52, %v1160_v23  ;;  %v1357_v55 = vmul.f32 %v3177_v42, %v3177_v42 }
 0x225   :  { %v1110_v8 = vsel %vm1106_vm8, %v1090_v33, %v3118_v21  ;;  %v1112_v37 = vsel %vm1108_vm11, %v3124_v59, %v1111_v10  ;;  %v1156_v18 = vshrl.u32 %v1151_v38, 16  ;;  %v882_v51 = vand.u32 2147483647, %v3172_v13 }
 0x226   :  { %v1037_v24 = vand.u32 2147483647, %v1036_v26  ;;  %v3199_v1 = vadd.s32 %v1143_v17, %v1134_v58  ;;  %v1165_v3 = vadd.s32 %v1164_v15, %v1154_v63  ;;  %v1353_v54 = vsub.s32 4, %v3029_v62 }
 0x227   :  { %v3203_v14 = vadd.s32 %v1159_v40, %v1155_v20  ;;  %v1039_v41 = vcvt.s32.f32 %v1032_v22  ;;  %v1113_v16 = vsel %vm1107_vm12, %v1110_v8, %v1112_v37  ;;  %v884_v34 = vcvt.s32.f32 %v877_v46 }
 0x228   :  { %v1166_v21 = vadd.s32 %v1165_v3, %v1156_v18  ;;  %v1358_v57 = vmul.f32 -0.001358992, %v1357_v55  ;;  %v1365_v38 = vmul.f32 -0.00019511016, %v1357_v55  ;;  %v1354_v13 = vsel %vm1231_vm6, %v1353_v54, %v3029_v62 }
 0x229   :  { %vm1169_vm4 = vc.u32 %v3199_v1, %v3203_v14  ;;  %v1040_v59 = vmul.f32 %v1039_v41, %v1037_v24  ;;  %v885_v11 = vmul.f32 %v884_v34, %v882_v51  ;;  %v1167_v20 = vmul.u32 %v3137_v2, %v1113_v16 }
 0x22a   :  { %v1170_v56 = vadd.s32 1, %v1166_v21  ;;  %v1359_v40 = vadd.f32 0.041655596, %v1358_v57  ;;  %v1366_v19 = vadd.f32 0.008332121, %v1365_v38  ;;  %v1356_v4 = vsel %vm3130_vm7, 0, %v1354_v13 }
 0x22b   :  { %v1041_v10 = vxor.u32 2147483648, %v1040_v59  ;;  %v886_v6 = vxor.u32 2147483648, %v885_v11  ;;  %vm921_vm5 = vcmp.lt.s32.totalorder %v2936_v45, 0  ;;  %v1373_v62 = vadd.s32 3, %v1356_v4 }
 0x22c   :  { %v1171_v35 = vsel %vm1169_vm4, %v1170_v56, %v1166_v21  ;;  %v1360_v23 = vmul.f32 %v1359_v40, %v1357_v55  ;;  %v1367_v12 = vmul.f32 %v1366_v19, %v1357_v55  ;;  %vm766_vm6 = vcmp.lt.s32.totalorder %v2869_v61, 0 }
 0x22d   :  { %v1172_v32 = vadd.s32 %v1171_v35, %v1167_v20  ;;  %v1042_v2 = vsel %vm921_vm5, %v1041_v10, %v1040_v59  ;;  %v887_v9 = vsel %vm766_vm6, %v886_v6, %v885_v11  ;;  %vm3226_vm7 = vcmp.le.f32.partialorder %v919_v50, 0.7853982 }
 0x22e   :  { %v1361_v26 = vadd.f32 -0.4999988, %v1360_v23  ;;  %v1368_v33 = vadd.f32 -0.16666654, %v1367_v12  ;;  %vm3232_vm8 = vcmp.le.f32.partialorder %v764_v60, 0.7853982  ;;  %vm1372_vm14 = vweird.f32 %v2905_v47 }
 0x22f   :  { %v1173_v48 = vadd.s32 536870912, %v1172_v32  ;;  %v1374_v24 = vand.u32 3, %v1373_v62  ;;  %v3244_v50 = vsel %vm3232_vm8, %v2869_v61, %v887_v9  ;;  %v1168_v40 = vadd.s32 %v3203_v14, %v3199_v1 }
 0x230   :  { %v1362_v52 = vmul.f32 %v1361_v26, %v1357_v55  ;;  %v1369_v22 = vmul.f32 %v1368_v33, %v1357_v55  ;;  %v3239_v55 = vsel %vm3226_vm7, %v2936_v45, %v1042_v2  ;;  %v3253_v41 = vmul.f32 %v3244_v50, %v3244_v50 }
 0x231   :  { %v3216_v63 = vshrl.u32 %v1173_v48, 30  ;;  %v3249_v51 = vmul.f32 %v3239_v55, %v3239_v55  ;;  %vm1376_vm10 = vcmp.eq.s32.totalorder %v1374_v24, 0  ;;  %vm1379_vm11 = vcmp.eq.s32.totalorder %v1374_v24, 2 }
 0x232   :  { %v1363_v15 = vadd.f32 1.0, %v1362_v52  ;;  %v1370_v46 = vadd.f32 1.0, %v1369_v22  ;;  %vm1375_vm12 = vcmp.lt.s32.totalorder %v1374_v24, 2  ;;  %v900_v13 = vmul.f32 -0.00019511016, %v3253_v41 }
 0x233   :  { %v1175_v58 = vshll.u32 %v3216_v63, 30  ;;  %v1055_v38 = vmul.f32 -0.00019511016, %v3249_v51  ;;  %v1048_v6 = vmul.f32 -0.001358992, %v3249_v51  ;;  %vm1076_vm1 = vcmp.lt.s32.totalorder %v3061_v0, 0 }
 0x234   :  { %v1371_v18 = vmul.f32 %v1370_v46, %v3177_v42  ;;  %v1380_v3 = vxor.u32 2147483648, %v1363_v15  ;;  %v901_v47 = vadd.f32 0.008332121, %v900_v13  ;;  %v893_v33 = vmul.f32 -0.001358992, %v3253_v41 }
 0x235   :  { %v1176_v37 = vsub.s32 %v1172_v32, %v1175_v58  ;;  %v1056_v10 = vadd.f32 0.008332121, %v1055_v38  ;;  %v1049_v14 = vadd.f32 0.041655596, %v1048_v6  ;;  %v888_v58 = vsub.s32 4, %v2984_v28 }
 0x236   :  { %v1377_v54 = vxor.u32 2147483648, %v1371_v18  ;;  %v1381_v59 = vsel %vm1379_vm11, %v1380_v3, %v1371_v18  ;;  %v902_v62 = vmul.f32 %v901_v47, %v3253_v41  ;;  %v894_v9 = vadd.f32 0.041655596, %v893_v33 }
 0x237   :  { %vm1177_vm9 = vcmp.lt.s32.totalorder %v1176_v37, 0  ;;  %v1178_v60 = vsub.s32 0, %v1176_v37  ;;  %vm3284_vm2 = vcmp.le.f32.partialorder %v1074_v49, 0.7853982  ;;  %vm1062_vm11 = vweird.f32 %v2936_v45 }
 0x238   :  { %v1378_v34 = vsel %vm1376_vm10, %v1363_v15, %v1377_v54  ;;  %v1043_v15 = vsub.s32 4, %v3103_v7  ;;  %v903_v24 = vadd.f32 -0.16666654, %v902_v62  ;;  %v889_v54 = vsel %vm766_vm6, %v888_v58, %v2984_v28 }
 0x239   :  { %v1179_v16 = vsel %vm1177_vm9, %v1178_v60, %v1176_v37  ;;  %v1382_v42 = vsel %vm1375_vm12, %v1378_v34, %v1381_v59  ;;  %v895_v60 = vmul.f32 %v894_v9, %v3253_v41  ;;  %v891_v49 = vsel %vm3232_vm8, 0, %v889_v54 }
 0x23a   :  { %v1180_v21 = vclz %v1179_v16  ;;  %v1383_v57 = vsel %vm1372_vm14, nan, %v1382_v42  ;;  %v1044_v16 = vsel %vm921_vm5, %v1043_v15, %v3103_v7  ;;  %v908_v6 = vadd.s32 3, %v891_v49 }
 0x23b   :  { %v1387_v11 = vmul.f32 0.5, %v1383_v57  ;;  %v1046_v7 = vsel %vm3226_vm7, 0, %v1044_v16  ;;  %vm1217_vm14 = vweird.f32 %v3061_v0 }
 0x23c   :  { %v2219_v56 = vadd.s32 4294967294, %v1180_v21  ;;  %v1198_v21 = vsub.s32 4, %v3216_v63 }
 0x23d   :  { %v3259_v35 = vadd.f32 %v1387_v11, %v2832_v44  ;;  %v1057_v44 = vmul.f32 %v1056_v10, %v3249_v51  ;;  %v896_v11 = vadd.f32 -0.4999988, %v895_v60  ;;  %v1063_v10 = vadd.s32 3, %v1046_v7  ;;  %v2228_v60 = vld [vmem:[%s3871_s3 + $0x20] sm:$0xff] }
 0x23e   :  { %vm2220_vm15 = vcmp.lt.s32.totalorder %v2219_v56, 0  ;;  %v1199_v13 = vsel %vm1076_vm1, %v1198_v21, %v3216_v63  ;;  %1404 = vperm.xlu2 %2267, %v2228_v60  }
 0x23f   :  { %v1183_v20 = vsel %vm2220_vm15, 0, %v2219_v56  ;;  %1446 = vmatpush.msra.mxu2 %v3259_v35  ;;  %2253 = vmatpush.msrb.mxu3 %v3259_v35  ;;  %v1058_v22 = vadd.f32 -0.16666654, %v1057_v44  ;;  %v904_v56 = vmul.f32 %v903_v24, %v3253_v41  ;;  %v897_v17 = vmul.f32 %v896_v11, %v3253_v41 }
 0x240   :  { %v1184_v19 = vsub.s32 32, %v1183_v20  ;;  %v1188_v32 = vsub.s32 4294967266, %v1183_v20  ;;  %v1185_v4 = vshll.u32 %v1176_v37, %v1183_v20  ;;  %v1050_v37 = vmul.f32 %v1049_v14, %v3249_v51 }
 0x241   :  { %v1059_v3 = vmul.f32 %v1058_v22, %v3249_v51  ;;  %v1064_v44 = vand.u32 3, %v1063_v10  ;;  %v898_v14 = vadd.f32 1.0, %v897_v17  ;;  %vm907_vm15 = vweird.f32 %v2869_v61  ;;  %v2128_v10 = vld [vmem:[%s3873_s5] sm:$0xff] }
 0x242   :  { %v1186_v23 = vshrl.u32 %v1168_v40, %v1184_v19  ;;  %v1189_v12 = vadd.s32 127, %v1188_v32  ;;  %v1051_v42 = vadd.f32 -0.4999988, %v1050_v37  ;;  %v905_v32 = vadd.f32 1.0, %v904_v56 }
 0x243   :  { %v1060_v38 = vadd.f32 1.0, %v1059_v3  ;;  %vm1066_vm3 = vcmp.eq.s32.totalorder %v1064_v44, 0  ;;  %vm1065_vm4 = vcmp.lt.s32.totalorder %v1064_v44, 2  ;;  %vm1069_vm5 = vcmp.eq.s32.totalorder %v1064_v44, 2 }
 0x244   :  { %v1187_v48 = vor.u32 %v1186_v23, %v1185_v4  ;;  %v1190_v26 = vshll.u32 %v1189_v12, 23  ;;  %v1052_v19 = vmul.f32 %v1051_v42, %v3249_v51  ;;  %v1201_v12 = vsel %vm3284_vm2, 0, %v1199_v13 }
 0x245   :  { %v1061_v23 = vmul.f32 %v1060_v38, %v3239_v55  ;;  %v1218_v62 = vadd.s32 3, %v1201_v12  ;;  %v2229_v38 = vld [vmem:[%s3871_s3 + $0x28] sm:$0xff] }
 0x246   :  { %v1191_v1 = vor.u32 4788187, %v1190_v26  ;;  %v1194_v52 = vcvt.s32.f32 %v1187_v48  ;;  %v1053_v8 = vadd.f32 1.0, %v1052_v19  ;;  %v906_v26 = vmul.f32 %v905_v32, %v3244_v50  ;;  %1409 = vperm.xlu2 %2267, %v2229_v38   ;;  %v2094_v19 = vld [vmem:[%s3872_s4 + $0x18] sm:$0xff]  ;;  %v2226_v32 = vld [vmem:[%s3870_s2 + $0x30] sm:$0xff] }
 0x247   :  { %v1219_v37 = vand.u32 3, %v1218_v62 }
 0x248   :  { %v1192_v2 = vand.u32 2147483647, %v1191_v1  ;;  %v1067_v1 = vxor.u32 2147483648, %v1061_v23  ;;  %v1070_v22 = vxor.u32 2147483648, %v1053_v8  ;;  %v912_v41 = vxor.u32 2147483648, %v906_v26 }
 0x249   :  { %vm1221_vm9 = vcmp.eq.s32.totalorder %v1219_v37, 0  ;;  %vm1224_vm10 = vcmp.eq.s32.totalorder %v1219_v37, 2  ;;  %vm1220_vm12 = vcmp.lt.s32.totalorder %v1219_v37, 2 }
 0x24a   :  { %v1195_v46 = vmul.f32 %v1194_v52, %v1192_v2  ;;  %v909_v2 = vand.u32 3, %v908_v6  ;;  %v1068_v15 = vsel %vm1066_vm3, %v1053_v8, %v1067_v1 }
 0x24c   :  { %v1196_v18 = vxor.u32 2147483648, %v1195_v46  ;;  %vm911_vm6 = vcmp.eq.s32.totalorder %v909_v2, 0  ;;  %vm914_vm7 = vcmp.eq.s32.totalorder %v909_v2, 2  ;;  %vm910_vm8 = vcmp.lt.s32.totalorder %v909_v2, 2 }
 0x24d   :  { %v913_v3 = vsel %vm911_vm6, %v898_v14, %v912_v41 }
 0x24e   :  { %v1197_v59 = vsel %vm1076_vm1, %v1196_v18, %v1195_v46  ;;  %v915_v46 = vxor.u32 2147483648, %v898_v14  ;;  %v1071_v18 = vsel %vm1069_vm5, %v1070_v22, %v1061_v23 }
 0x24f   :  { %v1200_v28 = vsel %vm3284_vm2, %v3061_v0, %v1197_v59  ;;  %v1072_v54 = vsel %vm1065_vm4, %v1068_v15, %v1071_v18 }
 0x250   :  { %v1202_v57 = vmul.f32 %v1200_v28, %v1200_v28  ;;  %v916_v21 = vsel %vm914_vm7, %v915_v46, %v906_v26  ;;  %v1073_v56 = vsel %vm1062_vm11, nan, %v1072_v54 }
 0x251   :  { %v917_v34 = vsel %vm910_vm8, %v913_v3, %v916_v21  ;;  %v1385_v13 = vmul.f32 0.5, %v1073_v56 }
 0x252   :  { %v1203_v20 = vmul.f32 -0.001358992, %v1202_v57  ;;  %v1210_v40 = vmul.f32 -0.00019511016, %v1202_v57  ;;  %v918_v7 = vsel %vm907_vm15, nan, %v917_v34 }
 0x253   :  { %v1384_v49 = vmul.f32 0.5, %v918_v7  ;;  %v3318_v0 = vadd.f32 %v1385_v13, %v2842_v30  ;;  %v2091_v30 = vld [vmem:[%s3872_s4] sm:$0xff] }
 0x254   :  { %v1204_v47 = vadd.f32 0.041655596, %v1203_v20  ;;  %v1211_v4 = vadd.f32 0.008332121, %v1210_v40  ;;  %v2227_v20 = vld [vmem:[%s3870_s2 + $0x38] sm:$0xff]  ;;  %2097 = vperm.xlu2 %2267, %v2091_v30   ;;  %v2225_v40 = vld [vmem:[%s3870_s2 + $0x28] sm:$0xff] }
 0x255   :  { %v3323_v61 = vadd.f32 %v1384_v49, %v2853_v43  ;;  %v2268_v43 = vld [vmem:[%s3868_s0] sm:$0xff] }
 0x256   :  { %v1205_v63 = vmul.f32 %v1204_v47, %v1202_v57  ;;  %v1212_v48 = vmul.f32 %v1211_v4, %v1202_v57  ;;  %v1420_v47 = vpop.permute.xlu1 %1419 }
 0x258   :  { %v1206_v33 = vadd.f32 -0.4999988, %v1205_v63  ;;  %v1213_v51 = vadd.f32 -0.16666654, %v1212_v48 }
 0x25a   :  { %v1207_v52 = vmul.f32 %v1206_v33, %v1202_v57  ;;  %v1214_v55 = vmul.f32 %v1213_v51, %v1202_v57 }
 0x25c   :  { %v1208_v9 = vadd.f32 1.0, %v1207_v52  ;;  %v1215_v58 = vadd.f32 1.0, %v1214_v55  ;;  %2112 = vperm.xlu2 %2267, %v2094_v19  }
 0x25e   :  { %v1216_v50 = vmul.f32 %v1215_v58, %v1200_v28  ;;  %v1225_v24 = vxor.u32 2147483648, %v1208_v9 }
 0x260   :  { %v1222_v16 = vxor.u32 2147483648, %v1216_v50  ;;  %v1226_v42 = vsel %vm1224_vm10, %v1225_v24, %v1216_v50 }
 0x262   :  { %v1223_v59 = vsel %vm1221_vm9, %v1208_v9, %v1222_v16 }
 0x263   :  { %v1227_v28 = vsel %vm1220_vm12, %v1223_v59, %v1226_v42 }
 0x264   :  { %v1228_v57 = vsel %vm1217_vm14, nan, %v1227_v28 }
 0x265   :  { %v1386_v11 = vmul.f32 0.5, %v1228_v57 }
 0x267   :  { %v3313_v45 = vadd.f32 %v1386_v11, %v2837_v53  ;;  %v2224_v53 = vld [vmem:[%s3870_s2 + $0x20] sm:$0xff] }
 0x269   :  { %1447 = vmatpush.msra.mxu2 %v3313_v45  ;;  %2254 = vmatpush.msrb.mxu3 %v3313_v45 }
 0x26b   :  { %1448 = vmatpush.msra.mxu2 %v3318_v0  ;;  %2255 = vmatpush.msrb.mxu3 %v3318_v0 }
 0x26d   :  { %1449 = vmatpush.msra.mxu2 %v3323_v61  ;;  %2256 = vmatpush.msrb.mxu3 %v3323_v61 }
 0x26e   :  { %2232 = vmatmul.msk.f32.vlgmr.msra.gmra.mxu2 %vm722_vm13, %v2224_v53  ;;  %2235 = vmatmul.msk.f32.vlgmr.msrb.gmra.mxu3 %vm722_vm13, %v2227_v20 }
 0x26f   :  { %2147 = vmatpush.msra.mxu3 %v2268_v43 }
 0x276   :  { %2233 = vmatmul.msk.f32.gmra.mxu2 %vm722_vm13, %v2225_v40  ;;  %2248 = vmatmul.msk.f32.vlgmr.msra.gmra.mxu3 %vm32_vm0, %v2128_v10 }
 0x27e   :  { %2234 = vmatmul.msk.f32.gmra.mxu2 %vm722_vm13, %v2226_v32 }
 0x298   :  { %v1405_v4 = vpop.permute.xlu2 %1404 }
 0x2f1   :  { %v1451_v23 = vpop.f32.mrf.mxu2  ;;  %v1460_v17 = vpop.f32.mrf.mxu3 }
 0x2f2   :  { %v3356_v12 = vadd.f32 %v1451_v23, %v1405_v4  ;;  %v3358_v6 = vadd.f32 %v1460_v17, %v1420_v47 }
 0x2f4   :  { %v1463_v63 = vand.u32 2147483647, %v3356_v12  ;;  %v1466_v48 = vand.u32 2139095040, %v3356_v12  ;;  %v1931_v8 = vand.u32 2139095040, %v3358_v6  ;;  %v1928_v52 = vand.u32 2147483647, %v3358_v6 }
 0x2f6   :  { %v1467_v26 = vshrl.u32 %v1466_v48, 23  ;;  %v1932_v44 = vshrl.u32 %v1931_v8, 23  ;;  %v1470_v51 = vand.u32 8388607, %v1463_v63  ;;  %v1935_v15 = vand.u32 8388607, %v1928_v52 }
 0x2f8   :  { %v2236_v33 = vadd.s32 4294967169, %v1467_v26  ;;  %v2245_v1 = vadd.s32 4294967169, %v1932_v44  ;;  %v1471_v2 = vor.u32 8388608, %v1470_v51  ;;  %v1936_v49 = vor.u32 8388608, %v1935_v15 }
 0x2fa   :  { %v1473_v14 = vadd.s32 1, %v2236_v33  ;;  %v1938_v62 = vadd.s32 1, %v2245_v1  ;;  %v3368_v58 = vshll.u32 %v1471_v2, 8 }
 0x2fc   :  { %vm1474_vm0 = vcmp.gt.s32.totalorder %v1473_v14, 0  ;;  %vm1939_vm13 = vcmp.gt.s32.totalorder %v1938_v62, 0  ;;  %v1512_v30 = vand.u32 65535, %v3368_v58  ;;  %v1513_v19 = vshrl.u32 %v3368_v58, 16 }
 0x2fd   :  { %v1475_v55 = vsel %vm1474_vm0, %v1473_v14, 0  ;;  %v1940_v41 = vsel %vm1939_vm13, %v1938_v62, 0  ;;  %v3439_v14 = vshll.u32 %v1936_v49, 8 }
 0x2fe   :  { %v1477_v22 = vand.u32 31, %v1475_v55  ;;  %v3372_v46 = vshrl.u32 %v1475_v55, 5  ;;  %v3376_v24 = vand.u32 31, %v1940_v41  ;;  %v3437_v1 = vshrl.u32 %v1940_v41, 5 }
 0x300   :  { %v3366_v9 = vsub.s32 32, %v1477_v22  ;;  %v1480_v37 = vshll.u32 %v2297_v25, %v1477_v22  ;;  %v1483_v50 = vshll.u32 %v2298_v27, %v1477_v22  ;;  %v1486_v60 = vshll.u32 %v2299_v29, %v1477_v22 }
 0x301   :  { %v1489_v16 = vshll.u32 %v2300_v31, %v1477_v22  ;;  %v1492_v34 = vshll.u32 %v2301_v36, %v1477_v22  ;;  %vm1495_vm1 = vcmp.lt.s32.totalorder %v3372_v46, 1  ;;  %v3399_v38 = vsub.s32 32, %v3376_v24 }
 0x302   :  { %v1481_v18 = vshrl.u32 %v2298_v27, %v3366_v9  ;;  %v1484_v3 = vshrl.u32 %v2299_v29, %v3366_v9  ;;  %v1487_v54 = vshrl.u32 %v2300_v31, %v3366_v9  ;;  %v1490_v21 = vshrl.u32 %v2301_v36, %v3366_v9 }
 0x303   :  { %v1493_v59 = vshrl.u32 %v2302_v39, %v3366_v9  ;;  %vm1498_vm2 = vcmp.lt.s32.totalorder %v3372_v46, 4  ;;  %vm1497_vm3 = vcmp.lt.s32.totalorder %v3372_v46, 3  ;;  %vm1496_vm4 = vcmp.lt.s32.totalorder %v3372_v46, 2 }
 0x304   :  { %v3391_v42 = vor.u32 %v1481_v18, %v1480_v37  ;;  %v3393_v56 = vor.u32 %v1484_v3, %v1483_v50  ;;  %v3395_v28 = vor.u32 %v1487_v54, %v1486_v60  ;;  %v1491_v57 = vor.u32 %v1490_v21, %v1489_v16 }
 0x305   :  { %v1494_v7 = vor.u32 %v1493_v59, %v1492_v34  ;;  %v1946_v47 = vshrl.u32 %v2298_v27, %v3399_v38  ;;  %v1949_v4 = vshrl.u32 %v2299_v29, %v3399_v38  ;;  %v1945_v26 = vshll.u32 %v2297_v25, %v3376_v24 }
 0x306   :  { %v1503_v11 = vsel %vm1495_vm1, %v3391_v42, %v3393_v56  ;;  %v1507_v13 = vsel %vm1495_vm1, %v3393_v56, %v3395_v28  ;;  %v1504_v53 = vsel %vm1498_vm2, %v1491_v57, 920167782  ;;  %v1948_v44 = vshll.u32 %v2298_v27, %v3376_v24 }
 0x307   :  { %v1508_v20 = vsel %vm1498_vm2, %v1494_v7, 1326507024  ;;  %v1505_v43 = vsel %vm1497_vm3, %v3395_v28, %v1504_v53  ;;  %v3443_v55 = vor.u32 %v1946_v47, %v1945_v26  ;;  %v1951_v50 = vshll.u32 %v2299_v29, %v3376_v24  ;;  %v1454_v53 = vpop.f32.mrf.mxu2 }
 0x308   :  { %v1509_v40 = vsel %vm1497_vm3, %v1491_v57, %v1508_v20  ;;  %v1506_v32 = vsel %vm1496_vm4, %v1503_v11, %v1505_v43  ;;  %v3445_v22 = vor.u32 %v1949_v4, %v1948_v44  ;;  %v1952_v18 = vshrl.u32 %v2300_v31, %v3399_v38 }
 0x309   :  { %v1510_v10 = vsel %vm1496_vm4, %v1507_v13, %v1509_v40  ;;  %v1536_v48 = vand.u32 65535, %v1506_v32  ;;  %v1537_v8 = vshrl.u32 %v1506_v32, 16  ;;  %v1955_v7 = vshrl.u32 %v2301_v36, %v3399_v38  ;;  %v1410_v40 = vpop.permute.xlu2 %1409 }
 0x30a   :  { %v1514_v23 = vand.u32 65535, %v1510_v10  ;;  %v1515_v17 = vshrl.u32 %v1510_v10, 16  ;;  %v1954_v49 = vshll.u32 %v2300_v31, %v3376_v24  ;;  %v3465_v43 = vor.u32 %v1952_v18, %v1951_v50 }
 0x30b   :  { %v1539_v62 = vmul.u32 %v1537_v8, %v1512_v30  ;;  %v3441_v2 = vmul.u32 %v1536_v48, %v1513_v19  ;;  %v1538_v41 = vmul.u32 %v1536_v48, %v1512_v30  ;;  %v1541_v60 = vmul.u32 %v1537_v8, %v1513_v19 }
 0x30c   :  { %v1517_v33 = vmul.u32 %v1515_v17, %v1512_v30  ;;  %v3435_v51 = vmul.u32 %v1514_v23, %v1513_v19  ;;  %v1516_v15 = vmul.u32 %v1514_v23, %v1512_v30  ;;  %v1519_v3 = vmul.u32 %v1515_v17, %v1513_v19 }
 0x30d   :  { %v1542_v54 = vshll.u32 %v1539_v62, 16  ;;  %v1544_v34 = vshll.u32 %v3441_v2, 16  ;;  %v1956_v32 = vor.u32 %v1955_v7, %v1954_v49  ;;  %v1957_v10 = vshll.u32 %v2301_v36, %v3376_v24 }
 0x30e   :  { %v1520_v37 = vshll.u32 %v1517_v33, 16  ;;  %v1522_v16 = vshll.u32 %v3435_v51, 16  ;;  %v1958_v47 = vshrl.u32 %v2302_v39, %v3399_v38  ;;  %v3472_v4 = vadd.f32 %v1454_v53, %v1410_v40 }
 0x30f   :  { %vm1546_vm6 = vc.u32 %v1538_v41, %v1542_v54  ;;  %v3454_v57 = vadd.s32 %v1542_v54, %v1538_v41  ;;  %vm1960_vm9 = vcmp.lt.s32.totalorder %v3437_v1, 1  ;;  %vm1963_vm10 = vcmp.lt.s32.totalorder %v3437_v1, 4 }
 0x310   :  { %vm1524_vm5 = vc.u32 %v1516_v15, %v1520_v37  ;;  %v1526_v21 = vadd.s32 %v1520_v37, %v1516_v15  ;;  %v1547_v13 = vsel %vm1546_vm6, 1, %v2296_v5  ;;  %v1959_v17 = vor.u32 %v1958_v47, %v1957_v10 }
 0x311   :  { %v1525_v59 = vsel %vm1524_vm5, 1, %v2296_v5  ;;  %v1549_v30 = vadd.s32 %v1547_v13, %v1541_v60  ;;  %vm1550_vm8 = vc.u32 %v3454_v57, %v1544_v34  ;;  %vm1962_vm11 = vcmp.lt.s32.totalorder %v3437_v1, 3 }
 0x312   :  { %v1527_v11 = vadd.s32 %v1525_v59, %v1519_v3  ;;  %vm1528_vm7 = vc.u32 %v1526_v21, %v1522_v16  ;;  %v1551_v19 = vsel %vm1550_vm8, 1, %v2296_v5  ;;  %v1968_v8 = vsel %vm1960_vm9, %v3443_v55, %v3445_v22 }
 0x313   :  { %v1529_v20 = vsel %vm1528_vm7, 1, %v2296_v5  ;;  %v1553_v48 = vadd.s32 %v1551_v19, %v1549_v30  ;;  %v1969_v24 = vsel %vm1963_vm10, %v1956_v32, 920167782  ;;  %vm1961_vm12 = vcmp.lt.s32.totalorder %v3437_v1, 2 }
 0x314   :  { %v1531_v23 = vadd.s32 %v1529_v20, %v1527_v11  ;;  %v1970_v26 = vsel %vm1962_vm11, %v3465_v43, %v1969_v24  ;;  %v1972_v44 = vsel %vm1960_vm9, %v3445_v22, %v3465_v43  ;;  %v1977_v15 = vand.u32 65535, %v3439_v14 }
 0x315   :  { %v1521_v37 = vshrl.u32 %v1517_v33, 16  ;;  %v1543_v50 = vshrl.u32 %v1539_v62, 16  ;;  %v1971_v18 = vsel %vm1961_vm12, %v1968_v8, %v1970_v26  ;;  %v1973_v3 = vsel %vm1963_vm10, %v1959_v17, 1326507024 }
 0x316   :  { %v1500_v41 = vsel %vm1498_vm2, %v3395_v28, 2102212464  ;;  %v1974_v60 = vsel %vm1962_vm11, %v1956_v32, %v1973_v3  ;;  %v1978_v54 = vshrl.u32 %v3439_v14, 16  ;;  %v2001_v16 = vand.u32 65535, %v1971_v18 }
 0x317   :  { %v1532_v21 = vadd.s32 %v1531_v23, %v1521_v37  ;;  %v1554_v59 = vadd.s32 %v1553_v48, %v1543_v50  ;;  %v1975_v33 = vsel %vm1961_vm12, %v1972_v44, %v1974_v60  ;;  %v2002_v62 = vshrl.u32 %v1971_v18, 16 }
 0x318   :  { %v1479_v7 = vshrl.u32 %v2297_v25, %v3366_v9  ;;  %v1979_v11 = vand.u32 65535, %v1975_v33  ;;  %v1980_v13 = vshrl.u32 %v1975_v33, 16  ;;  %v1621_v49 = vand.u32 2139095040, %v3472_v4 }
 0x319   :  { %v1523_v28 = vshrl.u32 %v3435_v51, 16  ;;  %v1545_v53 = vshrl.u32 %v3441_v2, 16  ;;  %v2004_v20 = vmul.u32 %v2002_v62, %v1977_v15  ;;  %v2005_v30 = vmul.u32 %v2001_v16, %v1978_v54 }
 0x31a   :  { %v1499_v40 = vsel %vm1495_vm1, %v1479_v7, %v3391_v42  ;;  %v1501_v19 = vsel %vm1497_vm3, %v3393_v56, %v1500_v41  ;;  %v1982_v32 = vmul.u32 %v1980_v13, %v1977_v15  ;;  %v1983_v9 = vmul.u32 %v1979_v11, %v1978_v54 }
 0x31b   :  { %v3515_v10 = vadd.s32 %v1532_v21, %v1523_v28  ;;  %v1555_v47 = vadd.s32 %v1554_v59, %v1545_v53  ;;  %v2003_v23 = vmul.u32 %v2001_v16, %v1977_v15  ;;  %v2007_v17 = vshll.u32 %v2004_v20, 16 }
 0x31c   :  { %v1981_v51 = vmul.u32 %v1979_v11, %v1977_v15  ;;  %v1985_v48 = vshll.u32 %v1982_v32, 16  ;;  %v2006_v8 = vmul.u32 %v2002_v62, %v1978_v54  ;;  %v1622_v24 = vshrl.u32 %v1621_v49, 23 }
 0x31d   :  { %v1984_v26 = vmul.u32 %v1980_v13, %v1978_v54  ;;  %v2009_v44 = vshll.u32 %v2005_v30, 16  ;;  %vm2011_vm14 = vc.u32 %v2003_v23, %v2007_v17  ;;  %v2013_v37 = vadd.s32 %v2007_v17, %v2003_v23 }
 0x31e   :  { %v1987_v42 = vshll.u32 %v1983_v9, 16  ;;  %vm1989_vm15 = vc.u32 %v1981_v51, %v1985_v48  ;;  %v1991_v50 = vadd.s32 %v1985_v48, %v1981_v51  ;;  %v2012_v56 = vsel %vm2011_vm14, 1, %v2296_v5 }
 0x31f   :  { %v1944_v18 = vshrl.u32 %v2297_v25, %v3399_v38  ;;  %v1990_v3 = vsel %vm1989_vm15, 1, %v2296_v5  ;;  %v2014_v41 = vadd.s32 %v2012_v56, %v2006_v8  ;;  %vm2015_vm0 = vc.u32 %v2013_v37, %v2009_v44 }
 0x320   :  { %v3524_v15 = vadd.s32 %v3454_v57, %v1544_v34  ;;  %v1965_v60 = vsel %vm1963_vm10, %v3465_v43, 2102212464  ;;  %v1992_v54 = vadd.s32 %v1990_v3, %v1984_v26  ;;  %vm1993_vm13 = vc.u32 %v1991_v50, %v1987_v42 }
 0x321   :  { %v1559_v16 = vadd.s32 1, %v1555_v47  ;;  %v1994_v21 = vsel %vm1993_vm13, 1, %v2296_v5  ;;  %v2016_v38 = vsel %vm2015_vm0, 1, %v2296_v5  ;;  %v2239_v59 = vadd.s32 4294967169, %v1622_v24 }
 0x322   :  { %vm1558_vm1 = vc.u32 %v3515_v10, %v3524_v15  ;;  %v1986_v33 = vshrl.u32 %v1982_v32, 16  ;;  %v1996_v2 = vadd.s32 %v1994_v21, %v1992_v54  ;;  %v2018_v62 = vadd.s32 %v2016_v38, %v2014_v41 }
 0x323   :  { %v1502_v34 = vsel %vm1496_vm4, %v1499_v40, %v1501_v19  ;;  %v2008_v57 = vshrl.u32 %v2004_v20, 16  ;;  %v1628_v7 = vadd.s32 1, %v2239_v59  ;;  %v1964_v43 = vsel %vm1960_vm9, %v1944_v18, %v3443_v55 }
 0x324   :  { %v1966_v11 = vsel %vm1962_vm11, %v3445_v22, %v1965_v60  ;;  %v1988_v13 = vshrl.u32 %v1983_v9, 16  ;;  %v1997_v49 = vadd.s32 %v1996_v2, %v1986_v33  ;;  %v1560_v28 = vsel %vm1558_vm1, %v1559_v16, %v1555_v47 }
 0x325   :  { %v2010_v53 = vshrl.u32 %v2005_v30, 16  ;;  %v2019_v32 = vadd.s32 %v2018_v62, %v2008_v57  ;;  %vm1629_vm2 = vcmp.gt.s32.totalorder %v1628_v7, 0  ;;  %v1556_v23 = vmul.u32 %v3368_v58, %v1502_v34 }
 0x326   :  { %v3542_v46 = vadd.s32 %v1997_v49, %v1988_v13  ;;  %v1630_v20 = vsel %vm1629_vm2, %v1628_v7, 0  ;;  %v3544_v40 = vadd.s32 %v2013_v37, %v2009_v44  ;;  %v1967_v51 = vsel %vm1961_vm12, %v1964_v43, %v1966_v11 }
 0x327   :  { %v2020_v19 = vadd.s32 %v2019_v32, %v2010_v53  ;;  %v1632_v17 = vand.u32 31, %v1630_v20  ;;  %v1561_v55 = vadd.s32 %v1560_v28, %v1556_v23  ;;  %v1618_v9 = vand.u32 2147483647, %v3472_v4 }
 0x328   :  { %vm2023_vm3 = vc.u32 %v3542_v46, %v3544_v40  ;;  %v2021_v58 = vmul.u32 %v3439_v14, %v1967_v51  ;;  %v3566_v50 = vshrl.u32 %v1630_v20, 5 }
 0x329   :  { %v2024_v22 = vadd.s32 1, %v2020_v19  ;;  %v3550_v30 = vsub.s32 32, %v1632_v17  ;;  %v1562_v48 = vadd.s32 536870912, %v1561_v55  ;;  %v1625_v44 = vand.u32 8388607, %v1618_v9 }
 0x32a   :  { %v1635_v37 = vshll.u32 %v2297_v25, %v1632_v17  ;;  %v1644_v42 = vshll.u32 %v2300_v31, %v1632_v17  ;;  %v1638_v56 = vshll.u32 %v2298_v27, %v1632_v17  ;;  %v1641_v18 = vshll.u32 %v2299_v29, %v1632_v17 }
 0x32b   :  { %v2025_v47 = vsel %vm2023_vm3, %v2024_v22, %v2020_v19  ;;  %v1636_v8 = vshrl.u32 %v2298_v27, %v3550_v30  ;;  %v1639_v1 = vshrl.u32 %v2299_v29, %v3550_v30  ;;  %v1642_v26 = vshrl.u32 %v2300_v31, %v3550_v30 }
 0x32c   :  { %v2026_v24 = vadd.s32 %v2025_v47, %v2021_v58  ;;  %v1645_v14 = vshrl.u32 %v2301_v36, %v3550_v30  ;;  %v1648_v3 = vshrl.u32 %v2302_v39, %v3550_v30  ;;  %v3572_v41 = vshrl.u32 %v1562_v48, 30 }
 0x32d   :  { %v3574_v60 = vor.u32 %v1636_v8, %v1635_v37  ;;  %v3576_v21 = vor.u32 %v1639_v1, %v1638_v56  ;;  %v3578_v38 = vor.u32 %v1642_v26, %v1641_v18  ;;  %v1647_v59 = vshll.u32 %v2301_v36, %v1632_v17 }
 0x32e   :  { %v1646_v54 = vor.u32 %v1645_v14, %v1644_v42  ;;  %v2027_v16 = vadd.s32 536870912, %v2026_v24  ;;  %v1626_v33 = vor.u32 8388608, %v1625_v44  ;;  %vm1653_vm4 = vcmp.lt.s32.totalorder %v3566_v50, 4 }
 0x32f   :  { %v1649_v2 = vor.u32 %v1648_v3, %v1647_v59  ;;  %vm1650_vm5 = vcmp.lt.s32.totalorder %v3566_v50, 1  ;;  %vm1652_vm6 = vcmp.lt.s32.totalorder %v3566_v50, 3  ;;  %v1564_v34 = vshll.u32 %v3572_v41, 30 }
 0x330   :  { %v1659_v62 = vsel %vm1653_vm4, %v1646_v54, 920167782  ;;  %v3587_v57 = vshrl.u32 %v2027_v16, 30  ;;  %v1658_v7 = vsel %vm1650_vm5, %v3574_v60, %v3576_v21  ;;  %vm1651_vm7 = vcmp.lt.s32.totalorder %v3566_v50, 2 }
 0x331   :  { %v1660_v43 = vsel %vm1652_vm6, %v3578_v38, %v1659_v62  ;;  %v1662_v11 = vsel %vm1650_vm5, %v3576_v21, %v3578_v38  ;;  %v1663_v13 = vsel %vm1653_vm4, %v1649_v2, 1326507024  ;;  %v3603_v49 = vshll.u32 %v1626_v33, 8 }
 0x332   :  { %v1661_v28 = vsel %vm1651_vm7, %v1658_v7, %v1660_v43  ;;  %v1664_v53 = vsel %vm1652_vm6, %v1646_v54, %v1663_v13  ;;  %v3609_v32 = vsub.s32 %v1561_v55, %v1564_v34  ;;  %v2029_v23 = vshll.u32 %v3587_v57, 30 }
 0x333   :  { %v1665_v20 = vsel %vm1651_vm7, %v1662_v11, %v1664_v53  ;;  %v1667_v17 = vand.u32 65535, %v3603_v49  ;;  %v1692_v22 = vshrl.u32 %v1661_v28, 16  ;;  %v1668_v58 = vshrl.u32 %v3603_v49, 16  ;;  %v1457_v53 = vpop.f32.mrf.mxu2 }
 0x334   :  { %v1669_v19 = vand.u32 65535, %v1665_v20  ;;  %v1670_v51 = vshrl.u32 %v1665_v20, 16  ;;  %v1567_v47 = vsub.s32 0, %v3609_v32  ;;  %v3617_v48 = vsub.s32 %v2026_v24, %v2029_v23 }
 0x335   :  { %vm1566_vm8 = vcmp.lt.s32.totalorder %v3609_v32, 0  ;;  %v1691_v1 = vand.u32 65535, %v1661_v28  ;;  %v1694_v26 = vmul.u32 %v1692_v22, %v1667_v17  ;;  %v1696_v11 = vmul.u32 %v1692_v22, %v1668_v58 }
 0x336   :  { %v1672_v8 = vmul.u32 %v1670_v51, %v1667_v17  ;;  %v1673_v55 = vmul.u32 %v1669_v19, %v1668_v58  ;;  %v1671_v44 = vmul.u32 %v1669_v19, %v1667_v17  ;;  %v1568_v42 = vsel %vm1566_vm8, %v1567_v47, %v3609_v32 }
 0x337   :  { %v2032_v14 = vsub.s32 0, %v3617_v48  ;;  %v1674_v56 = vmul.u32 %v1670_v51, %v1668_v58  ;;  %vm2031_vm10 = vcmp.lt.s32.totalorder %v3617_v48, 0  ;;  %v1695_v54 = vmul.u32 %v1691_v1, %v1668_v58  ;;  %v1415_v51 = vpop.permute.xlu0 %1414 }
 0x338   :  { %v1675_v37 = vshll.u32 %v1672_v8, 16  ;;  %v1677_v18 = vshll.u32 %v1673_v55, 16  ;;  %v1697_v16 = vshll.u32 %v1694_v26, 16  ;;  %v1569_v59 = vclz %v1568_v42 }
 0x339   :  { %v1693_v62 = vmul.u32 %v1691_v1, %v1667_v17  ;;  %v2033_v34 = vsel %vm2031_vm10, %v2032_v14, %v3617_v48  ;;  %v1676_v7 = vshrl.u32 %v1672_v8, 16  ;;  %v1699_v13 = vshll.u32 %v1695_v54, 16 }
 0x33a   :  { %vm1679_vm9 = vc.u32 %v1671_v44, %v1675_v37  ;;  %v1681_v3 = vadd.s32 %v1675_v37, %v1671_v44  ;;  %v2237_v23 = vadd.s32 4294967294, %v1569_v59  ;;  %v2034_v47 = vclz %v2033_v34 }
 0x33b   :  { %v1680_v24 = vsel %vm1679_vm9, 1, %v2296_v5  ;;  %vm1701_vm12 = vc.u32 %v1693_v62, %v1697_v16  ;;  %v1703_v28 = vadd.s32 %v1697_v16, %v1693_v62  ;;  %v1655_v44 = vsel %vm1653_vm4, %v3578_v38, 2102212464 }
 0x33c   :  { %v1682_v33 = vadd.s32 %v1680_v24, %v1674_v56  ;;  %vm1683_vm11 = vc.u32 %v1681_v3, %v1677_v18  ;;  %v1702_v19 = vsel %vm1701_vm12, 1, %v2296_v5  ;;  %v1634_v8 = vshrl.u32 %v2297_v25, %v3550_v30 }
 0x33d   :  { %v1684_v2 = vsel %vm1683_vm11, 1, %v2296_v5  ;;  %v1704_v17 = vadd.s32 %v1702_v19, %v1696_v11  ;;  %vm1705_vm14 = vc.u32 %v1703_v28, %v1699_v13  ;;  %v1678_v22 = vshrl.u32 %v1673_v55, 16 }
 0x33e   :  { %v1686_v43 = vadd.s32 %v1684_v2, %v1682_v33  ;;  %v1706_v58 = vsel %vm1705_vm14, 1, %v2296_v5  ;;  %v3633_v1 = vadd.f32 %v1457_v53, %v1415_v51  ;;  %v1698_v37 = vshrl.u32 %v1694_v26, 16 }
 0x33f   :  { %v1708_v42 = vadd.s32 %v1706_v58, %v1704_v17  ;;  %v1654_v14 = vsel %vm1650_vm5, %v1634_v8, %v3574_v60  ;;  %v1656_v38 = vsel %vm1652_vm6, %v3576_v21, %v1655_v44  ;;  %vm2238_vm15 = vcmp.lt.s32.totalorder %v2237_v23, 0 }
 0x340   :  { %v1687_v20 = vadd.s32 %v1686_v43, %v1676_v7  ;;  %v2246_v18 = vadd.s32 4294967294, %v2034_v47  ;;  %v1700_v30 = vshrl.u32 %v1695_v54, 16  ;;  %v3643_v3 = vadd.s32 %v1703_v28, %v1699_v13 }
 0x341   :  { %v1709_v55 = vadd.s32 %v1708_v42, %v1698_v37  ;;  %v1776_v24 = vand.u32 2139095040, %v3633_v1  ;;  %v1657_v26 = vsel %vm1651_vm7, %v1654_v14, %v1656_v38  ;;  %v1572_v59 = vsel %vm2238_vm15, 0, %v2237_v23 }
 0x342   :  { %v3641_v56 = vadd.s32 %v1687_v20, %v1678_v22  ;;  %vm2247_vm13 = vcmp.lt.s32.totalorder %v2246_v18, 0  ;;  %v1711_v33 = vmul.u32 %v3603_v49, %v1657_v26  ;;  %v1577_v54 = vsub.s32 4294967266, %v1572_v59 }
 0x343   :  { %v1710_v16 = vadd.s32 %v1709_v55, %v1700_v30  ;;  %v1777_v60 = vshrl.u32 %v1776_v24, 23  ;;  %v3651_v34 = vsel %vm2247_vm13, 0, %v2246_v18  ;;  %v1773_v43 = vand.u32 2147483647, %v3633_v1 }
 0x344   :  { %vm1713_vm0 = vc.u32 %v3641_v56, %v3643_v3  ;;  %v1578_v13 = vadd.s32 127, %v1577_v54  ;;  %v2042_v28 = vsub.s32 4294967266, %v3651_v34  ;;  %v1573_v19 = vsub.s32 32, %v1572_v59 }
 0x345   :  { %v1714_v21 = vadd.s32 1, %v1710_v16  ;;  %v2242_v2 = vadd.s32 4294967169, %v1777_v60  ;;  %v1780_v23 = vand.u32 8388607, %v1773_v43  ;;  %v1557_v8 = vadd.s32 %v3524_v15, %v3515_v10 }
 0x346   :  { %v1579_v47 = vshll.u32 %v1578_v13, 23  ;;  %v2043_v44 = vadd.s32 127, %v2042_v28  ;;  %v2022_v42 = vadd.s32 %v3544_v40, %v3542_v46  ;;  %v2038_v18 = vsub.s32 32, %v3651_v34 }
 0x347   :  { %v1715_v62 = vsel %vm1713_vm0, %v1714_v21, %v1710_v16  ;;  %v1783_v50 = vadd.s32 1, %v2242_v2  ;;  %v1781_v58 = vor.u32 8388608, %v1780_v23  ;;  %v1575_v37 = vshrl.u32 %v1557_v8, %v1573_v19 }
 0x348   :  { %v1716_v7 = vadd.s32 %v1715_v62, %v1711_v33  ;;  %v1580_v38 = vor.u32 4788187, %v1579_v47  ;;  %v2044_v30 = vshll.u32 %v2043_v44, 23  ;;  %v1574_v62 = vshll.u32 %v3609_v32, %v1572_v59 }
 0x349   :  { %vm1784_vm1 = vcmp.gt.s32.totalorder %v1783_v50, 0  ;;  %v3673_v15 = vshll.u32 %v1781_v58, 8  ;;  %vm1620_vm12 = vcmp.lt.s32.totalorder %v3472_v4, 0  ;;  %vm1465_vm15 = vcmp.lt.s32.totalorder %v3356_v12, 0 }
 0x34a   :  { %v1717_v11 = vadd.s32 536870912, %v1716_v7  ;;  %v1785_v49 = vsel %vm1784_vm1, %v1783_v50, 0  ;;  %v1581_v19 = vand.u32 2147483647, %v1580_v38  ;;  %vm3748_vm0 = vcmp.le.f32.partialorder %v1618_v9, 0.7853982 }
 0x34b   :  { %v1787_v20 = vand.u32 31, %v1785_v49  ;;  %v3685_v50 = vshrl.u32 %v1785_v49, 5  ;;  %v1822_v59 = vand.u32 65535, %v3673_v15  ;;  %vm3754_vm13 = vcmp.le.f32.partialorder %v1463_v63, 0.7853982 }
 0x34c   :  { %v3655_v53 = vshrl.u32 %v1717_v11, 30  ;;  %vm1930_vm1 = vcmp.lt.s32.totalorder %v3358_v6, 0 }
 0x34d   :  { %v3660_v17 = vsub.s32 32, %v1787_v20  ;;  %v1790_v46 = vshll.u32 %v2297_v25, %v1787_v20  ;;  %v1793_v40 = vshll.u32 %v2298_v27, %v1787_v20  ;;  %v1796_v21 = vshll.u32 %v2299_v29, %v1787_v20 }
 0x34e   :  { %v1719_v51 = vshll.u32 %v3655_v53, 30  ;;  %v1799_v33 = vshll.u32 %v2300_v31, %v1787_v20  ;;  %v1802_v2 = vshll.u32 %v2301_v36, %v1787_v20  ;;  %vm1805_vm4 = vcmp.lt.s32.totalorder %v3685_v50, 1 }
 0x34f   :  { %v1791_v55 = vshrl.u32 %v2298_v27, %v3660_v17  ;;  %v1794_v26 = vshrl.u32 %v2299_v29, %v3660_v17  ;;  %v1797_v10 = vshrl.u32 %v2300_v31, %v3660_v17  ;;  %v1800_v60 = vshrl.u32 %v2301_v36, %v3660_v17 }
 0x350   :  { %v1720_v22 = vsub.s32 %v1716_v7, %v1719_v51  ;;  %v1803_v54 = vshrl.u32 %v2302_v39, %v3660_v17  ;;  %v1576_v29 = vor.u32 %v1575_v37, %v1574_v62  ;;  %v2040_v31 = vshrl.u32 %v2022_v42, %v2038_v18 }
 0x351   :  { %v3687_v11 = vor.u32 %v1791_v55, %v1790_v46  ;;  %v3689_v27 = vor.u32 %v1794_v26, %v1793_v40  ;;  %v1798_v13 = vor.u32 %v1797_v10, %v1796_v21  ;;  %v1801_v28 = vor.u32 %v1800_v60, %v1799_v33 }
 0x352   :  { %vm1721_vm2 = vcmp.lt.s32.totalorder %v1720_v22, 0  ;;  %v1722_v14 = vsub.s32 0, %v1720_v22  ;;  %v1804_v23 = vor.u32 %v1803_v54, %v1802_v2  ;;  %v3691_v36 = vor.u32 4788187, %v2044_v30 }
 0x353   :  { %v1712_v39 = vadd.s32 %v3643_v3, %v3641_v56  ;;  %vm1808_vm5 = vcmp.lt.s32.totalorder %v3685_v50, 4  ;;  %v1813_v51 = vsel %vm1805_vm4, %v3687_v11, %v3689_v27  ;;  %v1817_v56 = vsel %vm1805_vm4, %v3689_v27, %v1798_v13 }
 0x354   :  { %v1723_v24 = vsel %vm1721_vm2, %v1722_v14, %v1720_v22  ;;  %v1814_v47 = vsel %vm1808_vm5, %v1801_v28, 920167782  ;;  %v1818_v3 = vsel %vm1808_vm5, %v1804_v23, 1326507024  ;;  %vm1807_vm6 = vcmp.lt.s32.totalorder %v3685_v50, 3 }
 0x355   :  { %v1724_v16 = vclz %v1723_v24  ;;  %vm1806_vm7 = vcmp.lt.s32.totalorder %v3685_v50, 2  ;;  %v1815_v37 = vsel %vm1807_vm6, %v1798_v13, %v1814_v47  ;;  %v1819_v42 = vsel %vm1807_vm6, %v1801_v28, %v1818_v3 }
 0x356   :  { %v1823_v14 = vshrl.u32 %v3673_v15, 16  ;;  %v1816_v30 = vsel %vm1806_vm7, %v1813_v51, %v1815_v37  ;;  %v2039_v46 = vshll.u32 %v3617_v48, %v3651_v34  ;;  %vm3781_vm2 = vcmp.le.f32.partialorder %v1928_v52, 0.7853982 }
 0x357   :  { %v2240_v7 = vadd.s32 4294967294, %v1724_v16  ;;  %v1846_v26 = vand.u32 65535, %v1816_v30  ;;  %v1847_v10 = vshrl.u32 %v1816_v30, 16  ;;  %v1583_v16 = vcvt.s32.f32 %v1576_v29 }
 0x358   :  { %v2041_v2 = vor.u32 %v2040_v31, %v2039_v46  ;;  %v1810_v31 = vsel %vm1808_vm5, %v1798_v13, 2102212464  ;;  %vm1775_vm5 = vcmp.lt.s32.totalorder %v3633_v1, 0 }
 0x359   :  { %vm2241_vm3 = vcmp.lt.s32.totalorder %v2240_v7, 0  ;;  %v1584_v33 = vmul.f32 %v1583_v16, %v1581_v19  ;;  %v1849_v54 = vmul.u32 %v1847_v10, %v1822_v59  ;;  %v1850_v62 = vmul.u32 %v1846_v26, %v1823_v14 }
 0x35a   :  { %v1727_v32 = vsel %vm2241_vm3, 0, %v2240_v7  ;;  %v2046_v7 = vand.u32 2147483647, %v3691_v36  ;;  %v1851_v48 = vmul.u32 %v1847_v10, %v1823_v14 }
 0x35b   :  { %v1728_v49 = vsub.s32 32, %v1727_v32  ;;  %v1732_v20 = vsub.s32 4294967266, %v1727_v32  ;;  %v1729_v44 = vshll.u32 %v1720_v22, %v1727_v32  ;;  %v1820_v22 = vsel %vm1806_vm7, %v1817_v56, %v1819_v42 }
 0x35c   :  { %v1824_v55 = vand.u32 65535, %v1820_v22  ;;  %v1825_v24 = vshrl.u32 %v1820_v22, 16  ;;  %v1852_v51 = vshll.u32 %v1849_v54, 16  ;;  %v1854_v56 = vshll.u32 %v1850_v62, 16 }
 0x35d   :  { %v1730_v8 = vshrl.u32 %v1712_v39, %v1728_v49  ;;  %v1733_v58 = vadd.s32 127, %v1732_v20  ;;  %v1848_v20 = vmul.u32 %v1846_v26, %v1822_v59  ;;  %v1811_v22 = vsel %vm1807_vm6, %v3689_v27, %v1810_v31 }
 0x35e   :  { %v1827_v60 = vmul.u32 %v1825_v24, %v1822_v59  ;;  %v1828_v21 = vmul.u32 %v1824_v55, %v1823_v14  ;;  %v1826_v23 = vmul.u32 %v1824_v55, %v1822_v59  ;;  %v1829_v49 = vmul.u32 %v1825_v24, %v1823_v14 }
 0x35f   :  { %v1731_v38 = vor.u32 %v1730_v8, %v1729_v44  ;;  %v1734_v18 = vshll.u32 %v1733_v58, 23  ;;  %vm1856_vm9 = vc.u32 %v1848_v20, %v1852_v51  ;;  %v1858_v19 = vadd.s32 %v1852_v51, %v1848_v20 }
 0x360   :  { %v1830_v39 = vshll.u32 %v1827_v60, 16  ;;  %v1832_v29 = vshll.u32 %v1828_v21, 16  ;;  %v1857_v3 = vsel %vm1856_vm9, 1, %v2296_v5  ;;  %v1789_v58 = vshrl.u32 %v2297_v25, %v3660_v17 }
 0x361   :  { %v1735_v40 = vor.u32 4788187, %v1734_v18  ;;  %v1738_v28 = vcvt.s32.f32 %v1731_v38  ;;  %v1859_v8 = vadd.s32 %v1857_v3, %v1851_v48  ;;  %vm1860_vm11 = vc.u32 %v1858_v19, %v1854_v56 }
 0x362   :  { %vm1834_vm8 = vc.u32 %v1826_v23, %v1830_v39  ;;  %v1836_v47 = vadd.s32 %v1830_v39, %v1826_v23  ;;  %v1831_v37 = vshrl.u32 %v1827_v60, 16  ;;  %v1861_v14 = vsel %vm1860_vm11, 1, %v2296_v5 }
 0x363   :  { %v1736_v32 = vand.u32 2147483647, %v1735_v40  ;;  %v1835_v34 = vsel %vm1834_vm8, 1, %v2296_v5  ;;  %v2048_v38 = vcvt.s32.f32 %v2041_v2  ;;  %v1853_v18 = vshrl.u32 %v1849_v54, 16 }
 0x364   :  { %v1837_v36 = vadd.s32 %v1835_v34, %v1829_v49  ;;  %vm1838_vm10 = vc.u32 %v1836_v47, %v1832_v29  ;;  %v1863_v30 = vadd.s32 %v1861_v14, %v1859_v8  ;;  %v1809_v13 = vsel %vm1805_vm4, %v1789_v58, %v3687_v11 }
 0x365   :  { %v1739_v44 = vmul.f32 %v1738_v28, %v1736_v32  ;;  %v1839_v59 = vsel %vm1838_vm10, 1, %v2296_v5  ;;  %v1833_v55 = vshrl.u32 %v1828_v21, 16  ;;  %v1855_v10 = vshrl.u32 %v1850_v62, 16 }
 0x366   :  { %v1841_v42 = vadd.s32 %v1839_v59, %v1837_v36  ;;  %v1864_v25 = vadd.s32 %v1863_v30, %v1853_v18  ;;  %v1585_v17 = vxor.u32 2147483648, %v1584_v33  ;;  %v2049_v16 = vmul.f32 %v2048_v38, %v2046_v7 }
 0x367   :  { %v1740_v26 = vxor.u32 2147483648, %v1739_v44  ;;  %v1862_v5 = vadd.s32 %v1858_v19, %v1854_v56  ;;  %v1812_v40 = vsel %vm1806_vm7, %v1809_v13, %v1811_v22  ;;  %v1587_v38 = vsub.s32 4, %v3572_v41 }
 0x368   :  { %v1842_v24 = vadd.s32 %v1841_v42, %v1831_v37  ;;  %v1865_v60 = vadd.s32 %v1864_v25, %v1855_v10  ;;  %v1586_v21 = vsel %vm1465_vm15, %v1585_v17, %v1584_v33  ;;  %v2050_v2 = vxor.u32 2147483648, %v2049_v16 }
 0x369   :  { %v1741_v11 = vsel %vm1620_vm12, %v1740_v26, %v1739_v44  ;;  %v1866_v54 = vmul.u32 %v3673_v15, %v1812_v40  ;;  %v3766_v9 = vsel %vm3754_vm13, %v3356_v12, %v1586_v21  ;;  %v1742_v17 = vsub.s32 4, %v3655_v53 }
 0x36a   :  { %v1843_v46 = vadd.s32 %v1842_v24, %v1833_v55  ;;  %v1869_v27 = vadd.s32 1, %v1865_v60  ;;  %v3761_v33 = vsel %vm3748_vm0, %v3472_v4, %v1741_v11  ;;  %v2051_v15 = vsel %vm1930_vm1, %v2050_v2, %v2049_v16 }
 0x36b   :  { %v3773_v23 = vmul.f32 %v3761_v33, %v3761_v33  ;;  %v3777_v39 = vmul.f32 %v3766_v9, %v3766_v9  ;;  %v3790_v20 = vsel %vm3781_vm2, %v3358_v6, %v2051_v15  ;;  %vm3837_vm6 = vcmp.le.f32.partialorder %v1773_v43, 0.7853982 }
 0x36c   :  { %vm1868_vm14 = vc.u32 %v1843_v46, %v1862_v5  ;;  %v3797_v48 = vmul.f32 %v3790_v20, %v3790_v20  ;;  %v1867_v55 = vadd.s32 %v1862_v5, %v1843_v46  ;;  %v2052_v46 = vsub.s32 4, %v3587_v57 }
 0x36d   :  { %v1870_v62 = vsel %vm1868_vm14, %v1869_v27, %v1865_v60  ;;  %v1754_v29 = vmul.f32 -0.00019511016, %v3773_v23  ;;  %v1599_v47 = vmul.f32 -0.00019511016, %v3777_v39  ;;  %v1747_v3 = vmul.f32 -0.001358992, %v3773_v23 }
 0x36e   :  { %v1871_v28 = vadd.s32 %v1870_v62, %v1866_v54  ;;  %v2064_v31 = vmul.f32 -0.00019511016, %v3797_v48  ;;  %v1592_v59 = vmul.f32 -0.001358992, %v3777_v39  ;;  %v2057_v30 = vmul.f32 -0.001358992, %v3797_v48 }
 0x36f   :  { %v1755_v56 = vadd.f32 0.008332121, %v1754_v29  ;;  %v1600_v19 = vadd.f32 0.008332121, %v1599_v47  ;;  %v1748_v14 = vadd.f32 0.041655596, %v1747_v3  ;;  %v1588_v27 = vsel %vm1465_vm15, %v1587_v38, %v3572_v41 }
 0x370   :  { %v1872_v63 = vadd.s32 536870912, %v1871_v28  ;;  %v2065_v42 = vadd.f32 0.008332121, %v2064_v31  ;;  %v1593_v18 = vadd.f32 0.041655596, %v1592_v59  ;;  %vm1761_vm15 = vweird.f32 %v3472_v4  ;;  %v2269_v4 = vld [vmem:[%s3868_s0] sm:$0xff] }
 0x371   :  { %v1756_v8 = vmul.f32 %v1755_v56, %v3773_v23  ;;  %v1601_v37 = vmul.f32 %v1600_v19, %v3777_v39  ;;  %v1749_v16 = vmul.f32 %v1748_v14, %v3773_v23  ;;  %v2058_v5 = vadd.f32 0.041655596, %v2057_v30  ;;  %s2303_s0 = smov [#allocation2]  }
 0x372   :  { %v3785_v49 = vshrl.u32 %v1872_v63, 30  ;;  %v2066_v25 = vmul.f32 %v2065_v42, %v3797_v48  ;;  %v1594_v21 = vmul.f32 %v1593_v18, %v3777_v39  ;;  %v1743_v63 = vsel %vm1620_vm12, %v1742_v17, %v3655_v53  ;;  %s2181_s5 = sshll.u32 %s2303_s0, 4  ;;  %s2182_s5 = int_to_ptr.vmem [resolvable:$true] %s2181_s5 }
 0x373   :  { %v1757_v22 = vadd.f32 -0.16666654, %v1756_v8  ;;  %v1602_v10 = vadd.f32 -0.16666654, %v1601_v37  ;;  %v1750_v41 = vadd.f32 -0.4999988, %v1749_v16 }
 0x374   :  { %v1874_v51 = vshll.u32 %v3785_v49, 30  ;;  %v2067_v15 = vadd.f32 -0.16666654, %v2066_v25  ;;  %v1595_v47 = vadd.f32 -0.4999988, %v1594_v21  ;;  %v1745_v56 = vsel %vm3748_vm0, 0, %v1743_v63 }
 0x375   :  { %v1758_v2 = vmul.f32 %v1757_v22, %v3773_v23  ;;  %v1897_v22 = vsub.s32 4, %v3785_v49  ;;  %vm1606_vm0 = vweird.f32 %v3356_v12  ;;  %v2098_v12 = vpop.permute.xlu2 %2097 }
 0x376   :  { %v1875_v52 = vsub.s32 %v1871_v28, %v1874_v51  ;;  %v1603_v28 = vmul.f32 %v1602_v10, %v3777_v39  ;;  %v1590_v51 = vsel %vm3754_vm13, 0, %v1588_v27  ;;  %v2068_v7 = vmul.f32 %v2067_v15, %v3797_v48 }
 0x377   :  { %v1759_v19 = vadd.f32 1.0, %v1758_v2  ;;  %v1607_v53 = vadd.s32 3, %v1590_v51  ;;  %v1596_v8 = vmul.f32 %v1595_v47, %v3777_v39 }
 0x378   :  { %vm1876_vm3 = vcmp.lt.s32.totalorder %v1875_v52, 0  ;;  %v1877_v34 = vsub.s32 0, %v1875_v52  ;;  %v1604_v3 = vadd.f32 1.0, %v1603_v28  ;;  %v2069_v18 = vadd.f32 1.0, %v2068_v7 }
 0x379   :  { %v1760_v50 = vmul.f32 %v1759_v19, %v3761_v33  ;;  %v1608_v38 = vand.u32 3, %v1607_v53  ;;  %v1597_v32 = vadd.f32 1.0, %v1596_v8 }
 0x37a   :  { %v1878_v36 = vsel %vm1876_vm3, %v1877_v34, %v1875_v52  ;;  %v2059_v34 = vmul.f32 %v2058_v5, %v3797_v48  ;;  %v1605_v14 = vmul.f32 %v1604_v3, %v3766_v9  ;;  %v2070_v43 = vmul.f32 %v2069_v18, %v3790_v20  ;;  %v2103_v5 = vpop.permute.xlu0 %2102 }
 0x37b   :  { %v1879_v44 = vclz %v1878_v36  ;;  %vm1610_vm7 = vcmp.eq.s32.totalorder %v1608_v38, 0  ;;  %vm1609_vm11 = vcmp.lt.s32.totalorder %v1608_v38, 2  ;;  %vm1613_vm12 = vcmp.eq.s32.totalorder %v1608_v38, 2 }
 0x37c   :  { %v2060_v37 = vadd.f32 -0.4999988, %v2059_v34  ;;  %v1611_v10 = vxor.u32 2147483648, %v1605_v14 }
 0x37d   :  { %v2243_v58 = vadd.s32 4294967294, %v1879_v44  ;;  %v1751_v44 = vmul.f32 %v1750_v41, %v3773_v23 }
 0x37e   :  { %v1612_v2 = vsel %vm1610_vm7, %v1597_v32, %v1611_v10 }
 0x37f   :  { %vm2244_vm4 = vcmp.lt.s32.totalorder %v2243_v58, 0 }
 0x380   :  { %v1882_v13 = vsel %vm2244_vm4, 0, %v2243_v58  ;;  %v1762_v58 = vadd.s32 3, %v1745_v56 }
 0x381   :  { %v1883_v24 = vsub.s32 32, %v1882_v13  ;;  %v1887_v26 = vsub.s32 4294967266, %v1882_v13  ;;  %v1884_v40 = vshll.u32 %v1875_v52, %v1882_v13  ;;  %v2053_v52 = vsel %vm1930_vm1, %v2052_v46, %v3587_v57 }
 0x382   :  { %v2055_v57 = vsel %vm3781_vm2, 0, %v2053_v52  ;;  %v1752_v13 = vadd.f32 1.0, %v1751_v44  ;;  %v1763_v33 = vand.u32 3, %v1762_v58  ;;  %vm2071_vm2 = vweird.f32 %v3358_v6 }
 0x383   :  { %v1885_v60 = vshrl.u32 %v1867_v55, %v1883_v24  ;;  %v1888_v11 = vadd.s32 127, %v1887_v26  ;;  %v2072_v30 = vadd.s32 3, %v2055_v57  ;;  %v2061_v55 = vmul.f32 %v2060_v37, %v3797_v48 }
 0x384   :  { %v1766_v24 = vxor.u32 2147483648, %v1760_v50  ;;  %v1769_v25 = vxor.u32 2147483648, %v1752_v13  ;;  %vm1765_vm8 = vcmp.eq.s32.totalorder %v1763_v33, 0  ;;  %vm1764_vm9 = vcmp.lt.s32.totalorder %v1763_v33, 2 }
 0x385   :  { %v1886_v54 = vor.u32 %v1885_v60, %v1884_v40  ;;  %v1889_v62 = vshll.u32 %v1888_v11, 23  ;;  %v1614_v40 = vxor.u32 2147483648, %v1597_v32  ;;  %v2073_v60 = vand.u32 3, %v2072_v30 }
 0x386   :  { %v1898_v11 = vsel %vm1775_vm5, %v1897_v22, %v3785_v49  ;;  %v2062_v27 = vadd.f32 1.0, %v2061_v55  ;;  %v1767_v21 = vsel %vm1765_vm8, %v1752_v13, %v1766_v24  ;;  %vm1768_vm10 = vcmp.eq.s32.totalorder %v1763_v33, 2 }
 0x387   :  { %v1890_v29 = vor.u32 4788187, %v1889_v62  ;;  %v1893_v36 = vcvt.s32.f32 %v1886_v54  ;;  %v2076_v54 = vxor.u32 2147483648, %v2070_v43  ;;  %v1770_v20 = vsel %vm1768_vm10, %v1769_v25, %v1760_v50 }
 0x388   :  { %v1900_v62 = vsel %vm3837_vm6, 0, %v1898_v11  ;;  %v1771_v63 = vsel %vm1764_vm9, %v1767_v21, %v1770_v20  ;;  %v1615_v51 = vsel %vm1613_vm12, %v1614_v40, %v1605_v14  ;;  %v2079_v49 = vxor.u32 2147483648, %v2062_v27  ;;  %v2113_v11 = vpop.permute.xlu2 %2112 }
 0x389   :  { %v1891_v31 = vand.u32 2147483647, %v1890_v29  ;;  %v1616_v47 = vsel %vm1609_vm11, %v1612_v2, %v1615_v51  ;;  %vm2075_vm14 = vcmp.eq.s32.totalorder %v2073_v60, 0  ;;  %v1917_v52 = vadd.s32 3, %v1900_v62 }
 0x38a   :  { %v2077_v34 = vsel %vm2075_vm14, %v2062_v27, %v2076_v54  ;;  %v1772_v56 = vsel %vm1761_vm15, nan, %v1771_v63  ;;  %vm2074_vm13 = vcmp.lt.s32.totalorder %v2073_v60, 2  ;;  %vm2078_vm1 = vcmp.eq.s32.totalorder %v2073_v60, 2 }
 0x38b   :  { %v1894_v59 = vmul.f32 %v1893_v36, %v1891_v31  ;;  %v2149_v36 = vpop.f32.mrf.mxu3  ;;  %v1617_v3 = vsel %vm1606_vm0, nan, %v1616_v47  ;;  %v2080_v53 = vsel %vm2078_vm1, %v2079_v49, %v2070_v43  ;;  %v2084_v8 = vmul.f32 0.5, %v1772_v56 }
 0x38c   :  { %v1918_v57 = vand.u32 3, %v1917_v52  ;;  %v2152_v58 = vmul.f32 %v2269_v4, %v2149_v36  ;;  %v2083_v14 = vmul.f32 0.5, %v1617_v3 }
 0x38d   :  { %v1895_v42 = vxor.u32 2147483648, %v1894_v59  ;;  %v2088_v30 = vadd.f32 %v2084_v8, %v3318_v0 }
 0x38e   :  { %vm1920_vm3 = vcmp.eq.s32.totalorder %v1918_v57, 0  ;;  %vm1923_vm4 = vcmp.eq.s32.totalorder %v1918_v57, 2  ;;  %v2153_v13 = vrot.slane %v2152_v58, 4  ;;  %v2087_v33 = vadd.f32 %v2083_v14, %v3323_v61 }
 0x38f   :  { %v1896_v39 = vsel %vm1775_vm5, %v1895_v42, %v1894_v59  ;;  %v2081_v59 = vsel %vm2074_vm13, %v2077_v34, %v2080_v53  ;;  %v2164_v42 = vpop.permute.xlu0 %2163  ;;  %vm1919_vm5 = vcmp.lt.s32.totalorder %v1918_v57, 2  ;;  %v2116_v6 = vmul.f32 %v2103_v5, %v2088_v30 }
 0x390   :  { %v1899_v9 = vsel %vm3837_vm6, %v3633_v1, %v1896_v39  ;;  %v2082_v38 = vsel %vm2071_vm2, nan, %v2081_v59  ;;  %v2166_v23 = vmul.f32 %v2269_v4, %v2164_v42  ;;  %vm1916_vm6 = vweird.f32 %v3633_v1 }
 0x391   :  { %v1901_v26 = vmul.f32 %v1899_v9, %v1899_v9  ;;  %v2086_v22 = vmul.f32 0.5, %v2082_v38  ;;  %v2115_v43 = vmul.f32 %v2098_v12, %v2087_v33 }
 0x392   :  { %v2167_v10 = vrot.slane %v2166_v23, 4 }
 0x393   :  { %v1902_v17 = vmul.f32 -0.001358992, %v1901_v26  ;;  %v1909_v16 = vmul.f32 -0.00019511016, %v1901_v26  ;;  %v2090_v0 = vadd.f32 %v2086_v22, %v3259_v35  ;;  %v2119_v60 = vadd.f32 %v2116_v6, %v2115_v43 }
 0x394   :  { %v2168_v61 = vadd.f32 %v2167_v10, %v2166_v23 }
 0x395   :  { %v1903_v46 = vadd.f32 0.041655596, %v1902_v17  ;;  %v1910_v48 = vadd.f32 0.008332121, %v1909_v16  ;;  %v2108_v17 = vpop.permute.xlu1 %2107  ;;  %v2118_v27 = vmul.f32 %v2113_v11, %v2090_v0 }
 0x397   :  { %v1904_v28 = vmul.f32 %v1903_v46, %v1901_v26  ;;  %v1911_v15 = vmul.f32 %v1910_v48, %v1901_v26  ;;  %v2169_v48 = vrot.slane %v2168_v61, 2 }
 0x399   :  { %v1905_v41 = vadd.f32 -0.4999988, %v1904_v28  ;;  %v1912_v29 = vadd.f32 -0.16666654, %v1911_v15  ;;  %v2170_v20 = vadd.f32 %v2169_v48, %v2168_v61 }
 0x39b   :  { %v1906_v19 = vmul.f32 %v1905_v41, %v1901_v26  ;;  %v1913_v31 = vmul.f32 %v1912_v29, %v1901_v26  ;;  %v2154_v26 = vadd.f32 %v2153_v13, %v2152_v58  ;;  %v2171_v15 = vrot.slane %v2170_v20, 1 }
 0x39d   :  { %v1907_v7 = vadd.f32 1.0, %v1906_v19  ;;  %v1914_v44 = vadd.f32 1.0, %v1913_v31  ;;  %v2155_v16 = vrot.slane %v2154_v26, 2  ;;  %v2172_v49 = vadd.f32 %v2171_v15, %v2170_v20 }
 0x39f   :  { %v1915_v37 = vmul.f32 %v1914_v44, %v1899_v9  ;;  %v1924_v50 = vxor.u32 2147483648, %v1907_v7  ;;  %v2156_v1 = vadd.f32 %v2155_v16, %v2154_v26 }
 0x3a1   :  { %v1921_v18 = vxor.u32 2147483648, %v1915_v37  ;;  %v1925_v32 = vsel %vm1923_vm4, %v1924_v50, %v1915_v37  ;;  %v2157_v2 = vrot.slane %v2156_v1, 1 }
 0x3a3   :  { %v1922_v39 = vsel %vm1920_vm3, %v1907_v7, %v1921_v18  ;;  %v2158_v28 = vadd.f32 %v2157_v2, %v2156_v1 }
 0x3a4   :  { %v1926_v9 = vsel %vm1919_vm5, %v1922_v39, %v1925_v32 }
 0x3a5   :  { %v1927_v55 = vsel %vm1916_vm6, nan, %v1926_v9  ;;  %v2159_v63 = vmul.f32 0.5, %v2158_v28 }
 0x3a6   :  { %v2085_v24 = vmul.f32 0.5, %v1927_v55 }
 0x3a8   :  { %v2089_v25 = vadd.f32 %v2085_v24, %v3313_v45 }
 0x3aa   :  { %v2117_v40 = vmul.f32 %v2108_v17, %v2089_v25 }
 0x3ac   :  { %v2120_v21 = vadd.f32 %v2119_v60, %v2117_v40 }
 0x3ae   :  { %v2121_v46 = vadd.f32 %v2120_v21, %v2118_v27 }
 0x3b0   :  { %v2122_v5 = vrot.slane %v2121_v46, 4 }
 0x3b2   :  { %v2123_v54 = vadd.f32 %v2122_v5, %v2121_v46 }
 0x3b4   :  { %v2124_v62 = vrot.slane %v2123_v54, 2 }
 0x3b6   :  { %v2125_v35 = vadd.f32 %v2124_v62, %v2123_v54 }
 0x3b8   :  { %v2126_v45 = vrot.slane %v2125_v35, 1 }
 0x3ba   :  { %v2127_v51 = vadd.f32 %v2126_v45, %v2125_v35 }
 0x3bc   :  { %v2173_v41 = vadd.f32 %v2159_v63, %v2127_v51 }
 0x3be   :  { %v2174_v29 = vadd.f32 %v2173_v41, %v2172_v49 }
 0x3c0   :  { %2175 = vst [vmem:[#allocation2] sm:$0x1] %v2174_v29 }
 0x3c1   :  { %2186 = dma.vmem_to_hbm [thread:$0]  %s2182_s5, 16, %s2184_s8, [#allocation3]  }
 0x3c2   :  { %2294 = dma.done.wait [#allocation3], 16  }
 0x3c3   :  { %2295 = vsyncadd [#allocation3], 4294967280 }
 0x3c4   :  { %2191 = vsyncpa [#allocation3], 1 }

</bundles_post_ra>
